<compile_context>
chip_gen: v7x
topology: tpu7x:2x2x1
jax: 0.10.0
libtpu: 0.0.40
codegen_flags: <defaults>
</compile_context>

<pallas_src>
import math
import numpy as np
import jax
import jax.numpy as jnp
from jax.experimental import pallas as pl
from jax.experimental.pallas import tpu as pltpu


BT = 8  # batch tile (sublane-aligned); one grid step processes BT sequences.


# ------------------------------ Fused kernel ---------------------------------
def atae_kernel(x_ref, lens_ref, apool_ref, cb_ref, wihw_ref, wiha_ref, b_ref,
                whh_ref, vh_ref, wd_ref, bd_ref, out_ref, gx_ref):
    # x_ref:    [L*BT, E]  word embeddings, time-major within the batch tile
    # lens_ref: [BT, 1] i32   valid lengths
    # apool_ref:[BT, E]       mean-pooled aspect embedding
    # cb_ref:   [BT, 1]       per-example constant attention-score offset
    # wihw_ref: [E, 4Hp]  word half of W_ih^T (gate blocks padded to Hp lanes)
    # wiha_ref: [E, 4Hp]  aspect half of W_ih^T
    # b_ref:    [1, 4Hp]  b_ih + b_hh
    # whh_ref:  [Hp, 4Hp] W_hh^T (rows/cols zero-padded)
    # vh_ref:   [1, Hp]   collapsed bi-linear attention vector (h part)
    # wd_ref:   [Hp, Pp]  dense weight^T, bd_ref: [1, Pp]
    # out_ref:  [BT, Pp]  logits (lane dense)
    # gx_ref:   [L*BT, 4Hp] scratch: precomputed input-side gates
    Bt = lens_ref.shape[0]
    Hp, G = whh_ref.shape
    L = x_ref.shape[0] // Bt

    # (1) Hoisted input projection: one throughput-friendly MXU matmul for all
    #     timesteps; the serial chain keeps only h @ W_hh.
    gx_ref[...] = jnp.dot(x_ref[...], wihw_ref[...],
                          preferred_element_type=jnp.float32)

    # (2) Aspect contribution is time-invariant -> fold into the bias once.
    abias = (jnp.dot(apool_ref[...], wiha_ref[...],
                     preferred_element_type=jnp.float32) + b_ref[...])  # [BT,G]

    lens = lens_ref[...]        # [BT, 1] i32 (hoisted out of the loop)
    cb = cb_ref[...]            # [BT, 1]
    vh = vh_ref[...]            # [1, Hp]

    def step(t, carry):
        h, c, m, d, acc = carry
        row = pl.multiple_of(t * Bt, Bt)
        g = (gx_ref[pl.ds(row, Bt), :] + abias
             + jnp.dot(h, whh_ref[...], preferred_element_type=jnp.float32))
        # PyTorch LSTM gate order i, f, g, o — full-vreg (128-lane) slices.
        i_g = jax.nn.sigmoid(g[:, 0 * Hp:1 * Hp])
        f_g = jax.nn.sigmoid(g[:, 1 * Hp:2 * Hp])
        g_g = jnp.tanh(g[:, 2 * Hp:3 * Hp])
        o_g = jax.nn.sigmoid(g[:, 3 * Hp:4 * Hp])
        c_new = f_g * c + i_g * g_g
        h_new = o_g * jnp.tanh(c_new)
        # packed-sequence semantics: freeze state / emit zeros for t >= len[b]
        valid = t < lens                                   # [BT, 1] bool
        c_nxt = jnp.where(valid, c_new, c)
        h_nxt = jnp.where(valid, h_new, h)
        h_emit = jnp.where(valid, h_new, jnp.zeros_like(h_new))
        # Online-softmax attention (bi_linear score collapsed to a matvec).
        s = jnp.sum(h_emit * vh, axis=-1, keepdims=True) + cb           # [BT,1]
        m_new = jnp.maximum(m, s)
        alpha = jnp.exp(m - m_new)
        p = jnp.exp(s - m_new)
        return (h_nxt, c_nxt, m_new, alpha * d + p, alpha * acc + p * h_emit)

    init = (jnp.zeros((Bt, Hp), jnp.float32),
            jnp.zeros((Bt, Hp), jnp.float32),
            jnp.full((Bt, 1), -jnp.inf, jnp.float32),
            jnp.zeros((Bt, 1), jnp.float32),
            jnp.zeros((Bt, Hp), jnp.float32))
    _, _, _, denom, acc = jax.lax.fori_loop(0, L, step, init, unroll=True)

    sh = acc * pl.reciprocal(denom, approx=True)                        # [BT,Hp]
    out_ref[...] = (jnp.dot(sh, wd_ref[...], preferred_element_type=jnp.float32)
                    + bd_ref[...])


# --------------------------- Parameter preparation ----------------------------
def _pad_gates(w, H, Hp):
    # [..., 4H] -> [..., 4Hp]; each gate block q lands at columns [q*Hp, q*Hp+H)
    parts = [w[..., q * H:(q + 1) * H] for q in range(4)]
    pad = [(0, 0)] * (w.ndim - 1) + [(0, Hp - H)]
    return jnp.concatenate([jnp.pad(p, pad) for p in parts], axis=-1)


def prepare_kernel_params(params):
    E = params["embed"].shape[1]
    H = params["whh"].shape[0]
    P = params["wd"].shape[1]
    Hp = ((H + 127) // 128) * 128
    Pp = ((P + 127) // 128) * 128

    wih = params["wih"]                                    # [2E, 4H] (W_ih^T)
    wih_a = _pad_gates(wih[:E], H, Hp)                     # aspect half
    wih_w = _pad_gates(wih[E:], H, Hp)                     # word half
    whh = jnp.pad(_pad_gates(params["whh"], H, Hp), ((0, Hp - H), (0, 0)))
    b = _pad_gates(params["b_lstm"], H, Hp)                # [1, 4Hp]

    # Collapse bi-linear attention: score = ha . v + bk.qw  with qw, v param-only
    qx = jnp.dot(params["q"], params["wq"]) + params["bq"]   # [1, D]
    qw = jnp.dot(qx, params["bil"])                          # [1, D]
    v = jnp.dot(params["wk"], qw.T)                          # [D, 1]
    c0 = jnp.dot(params["bk"], qw.T)                         # [1, 1]
    v_h = jnp.pad(v[:H, 0][None, :], ((0, 0), (0, Hp - H)))  # [1, Hp]
    v_a = v[H:H + E]                                         # [E, 1]

    wd = jnp.pad(params["wd"], ((0, Hp - H), (0, Pp - P)))   # [Hp, Pp]
    bd = jnp.pad(params["bd"], ((0, 0), (0, Pp - P)))        # [1, Pp]

    return dict(embed=params["embed"], wih_w=wih_w, wih_a=wih_a, whh=whh, b=b,
                v_h=v_h, v_a=v_a, c0=c0, wd=wd, bd=bd,
                E=E, H=H, P=P, Hp=Hp, Pp=Pp)


# ------------------------------- Full forward ---------------------------------
def atae_lstm_forward(kp, text_indices, aspect_indices):
    text_np = np.asarray(text_indices)
    x_len_np = (text_np != 0).sum(-1).astype(np.int32)
    L = int(x_len_np.max())                    # static max length (host side)
    B = text_np.shape[0]
    E, Hp, Pp, P = kp["E"], kp["Hp"], kp["Pp"], kp["P"]
    G = 4 * Hp

    x_len = jnp.asarray(x_len_np)
    aspect_len = jnp.sum(aspect_indices != 0, axis=-1).astype(jnp.float32)

    emb = kp["embed"]
    x = jnp.take(emb, text_indices, axis=0)[:, :L, :]              # [B, L, E]
    aspect = jnp.take(emb, aspect_indices, axis=0)                 # [B, Ta, E]
    aspect_pool = jnp.sum(aspect, axis=1) / aspect_len[:, None]    # [B, E]
    const_b = jnp.dot(aspect_pool, kp["v_a"]) + kp["c0"]           # [B, 1]

    # Pad batch to a multiple of the batch tile and lay x out time-major per tile.
    B_pad = ((B + BT - 1) // BT) * BT
    nb = B_pad // BT
    pb = B_pad - B
    x_p = jnp.pad(x, ((0, pb), (0, 0), (0, 0)))
    x2d = x_p.reshape(nb, BT, L, E).transpose(0, 2, 1, 3).reshape(nb * L * BT, E)
    lens_p = jnp.pad(x_len, (0, pb)).reshape(B_pad, 1).astype(jnp.int32)
    apool_p = jnp.pad(aspect_pool, ((0, pb), (0, 0)))
    cb_p = jnp.pad(const_b, ((0, pb), (0, 0)))

    out = pl.pallas_call(
        atae_kernel,
        out_shape=jax.ShapeDtypeStruct((B_pad, Pp), jnp.float32),
        grid_spec=pltpu.PrefetchScalarGridSpec(
            num_scalar_prefetch=0,
            grid=(nb,),
            in_specs=[
                pl.BlockSpec((L * BT, E), lambda b: (b, 0)),   # x (time-major)
                pl.BlockSpec((BT, 1), lambda b: (b, 0)),       # lens
                pl.BlockSpec((BT, E), lambda b: (b, 0)),       # aspect_pool
                pl.BlockSpec((BT, 1), lambda b: (b, 0)),       # const_b
                pl.BlockSpec((E, G), lambda b: (0, 0)),        # wih_w
                pl.BlockSpec((E, G), lambda b: (0, 0)),        # wih_a
                pl.BlockSpec((1, G), lambda b: (0, 0)),        # b
                pl.BlockSpec((Hp, G), lambda b: (0, 0)),       # whh
                pl.BlockSpec((1, Hp), lambda b: (0, 0)),       # v_h
                pl.BlockSpec((Hp, Pp), lambda b: (0, 0)),      # wd
                pl.BlockSpec((1, Pp), lambda b: (0, 0)),       # bd
            ],
            out_specs=pl.BlockSpec((BT, Pp), lambda b: (b, 0)),
            scratch_shapes=[pltpu.VMEM((L * BT, G), jnp.float32)],
        ),
        compiler_params=pltpu.CompilerParams(
            dimension_semantics=("parallel",)),
    )(x2d, lens_p, apool_p, cb_p, kp["wih_w"], kp["wih_a"], kp["b"],
      kp["whh"], kp["v_h"], kp["wd"], kp["bd"])
    return out[:B, :P]


# ---------------------- Pure-JAX reference (for checking) ---------------------
def reference_forward(params, text_indices, aspect_indices):
    text_np = np.asarray(text_indices)
    x_len = jnp.asarray((text_np != 0).sum(-1), jnp.int32)
    L = int((text_np != 0).sum(-1).max())
    aspect_len = jnp.sum(aspect_indices != 0, axis=-1).astype(jnp.float32)
    emb = params["embed"]
    x = jnp.take(emb, text_indices, axis=0)[:, :L, :]
    aspect = jnp.take(emb, aspect_indices, axis=0)
    aspect_pool = jnp.sum(aspect, axis=1) / aspect_len[:, None]
    B, _, E = x.shape
    H = params["whh"].shape[0]
    aspect_exp = jnp.broadcast_to(aspect_pool[:, None, :], (B, L, E))
    xc = jnp.concatenate([aspect_exp, x], axis=-1)

    h = jnp.zeros((B, H), jnp.float32)
    c = jnp.zeros((B, H), jnp.float32)
    hs = []
    for t in range(L):
        gates = xc[:, t, :] @ params["wih"] + h @ params["whh"] + params["b_lstm"]
        i = jax.nn.sigmoid(gates[:, :H]); f = jax.nn.sigmoid(gates[:, H:2 * H])
        g = jnp.tanh(gates[:, 2 * H:3 * H]); o = jax.nn.sigmoid(gates[:, 3 * H:])
        c_new = f * c + i * g
        h_new = o * jnp.tanh(c_new)
        mask = (t < x_len)[:, None]
        c = jnp.where(mask, c_new, c)
        h = jnp.where(mask, h_new, h)
        hs.append(jnp.where(mask, h_new, 0.0))
    hseq = jnp.stack(hs, axis=1)                                   # [B, L, H]
    ha = jnp.concatenate([hseq, aspect_exp], axis=-1)              # [B, L, D]
    kx = ha @ params["wk"] + params["bk"]
    qx = params["q"] @ params["wq"] + params["bq"]
    qw = qx @ params["bil"]
    score = jax.nn.softmax(jnp.einsum("bld,d->bl", kx, qw[0]), axis=-1)
    out = jnp.einsum("bl,blh->bh", score, hseq) @ params["wd"] + params["bd"]
    return out


# -------------------------------- Parameters ----------------------------------
def init_params(key, vocab_size, embed_dim, hidden_dim, polarities_dim=3, q_len=1):
    E, H = embed_dim, hidden_dim
    D = H + E
    ks = jax.random.split(key, 13)

    def u(k, shape, scale):
        return jax.random.uniform(k, shape, jnp.float32, -scale, scale)

    embed = u(ks[0], (vocab_size, E), 0.5).at[0].set(0.0)          # padding_idx=0
    s_l = 1.0 / math.sqrt(H)
    wih = u(ks[1], (2 * E, 4 * H), s_l)                            # weight_ih.T
    whh = u(ks[2], (H, 4 * H), s_l)                                # weight_hh.T
    b_lstm = u(ks[3], (1, 4 * H), s_l) + u(ks[4], (1, 4 * H), s_l)
    s_a = 1.0 / math.sqrt(D)
    wk = u(ks[5], (D, D), s_a); bk = u(ks[6], (1, D), s_a)
    wq = u(ks[7], (D, D), s_a); bq = u(ks[8], (1, D), s_a)
    bil = u(ks[9], (D, D), s_a)
    q = u(ks[10], (q_len, D), s_a)
    s_d = 1.0 / math.sqrt(H)
    wd = u(ks[11], (H, polarities_dim), s_d)
    bd = u(ks[12], (1, polarities_dim), s_d)
    return dict(embed=embed, wih=wih, whh=whh, b_lstm=b_lstm, wk=wk, bk=bk,
                wq=wq, bq=bq, bil=bil, q=q, wd=wd, bd=bd)


# ----------------------------------- Main --------------------------------------
if __name__ == "__main__":
    B, T, Ta = 2, 10, 4
    vocab, E, H, P = 50, 32, 32, 3

    key = jax.random.PRNGKey(0)
    pkey, tkey, akey = jax.random.split(key, 3)
    params = init_params(pkey, vocab, E, H, P)
    kparams = prepare_kernel_params(params)

    lens = jnp.asarray(np.array([8, 6], dtype=np.int32))
    alens = jnp.asarray(np.array([3, 2], dtype=np.int32))
    text_full = jax.random.randint(tkey, (B, T), 1, vocab, dtype=jnp.int32)
    asp_full = jax.random.randint(akey, (B, Ta), 1, vocab, dtype=jnp.int32)
    text_indices = jnp.where(jnp.arange(T)[None, :] < lens[:, None], text_full, 0)
    aspect_indices = jnp.where(jnp.arange(Ta)[None, :] < alens[:, None], asp_full, 0)

    out = atae_lstm_forward(kparams, text_indices, aspect_indices)
    out = jax.block_until_ready(out)
    assert out.shape == (B, P)
    assert bool(jnp.all(jnp.isfinite(out)))

    ref = jax.block_until_ready(reference_forward(params, text_indices, aspect_indices))
    max_err = float(jnp.max(jnp.abs(out - ref)))
    tol = 1e-2 + 1e-2 * float(jnp.max(jnp.abs(ref)))
    assert max_err <= tol, f"mismatch vs reference: {max_err} > {tol}"
    print("KERNEL_OK")
</pallas_src>

<mosaic_0001>
module attributes {stable_mosaic.version = 11 : i64} {
  func.func @atae_kernel(%arg0: i32, %arg1: memref<64x32xf32, #tpu.memory_space<vmem>>, %arg2: memref<8x1xi32, #tpu.memory_space<vmem>>, %arg3: memref<8x32xf32, #tpu.memory_space<vmem>>, %arg4: memref<8x1xf32, #tpu.memory_space<vmem>>, %arg5: memref<32x512xf32, #tpu.memory_space<vmem>>, %arg6: memref<32x512xf32, #tpu.memory_space<vmem>>, %arg7: memref<1x512xf32, #tpu.memory_space<vmem>>, %arg8: memref<128x512xf32, #tpu.memory_space<vmem>>, %arg9: memref<1x128xf32, #tpu.memory_space<vmem>>, %arg10: memref<128x128xf32, #tpu.memory_space<vmem>>, %arg11: memref<1x128xf32, #tpu.memory_space<vmem>>, %arg12: memref<8x128xf32, #tpu.memory_space<vmem>>, %arg13: memref<64x512xf32, #tpu.memory_space<vmem>>) attributes {dimension_semantics = [#tpu.dimension_semantics<parallel>], iteration_bounds = array<i64: 1>, scalar_prefetch = 0 : i64, scratch_operands = 1 : i64, tpu.core_type = #tpu.core_type<tc>, window_params = [{transform_indices = @transform_0, window_bounds = array<i64: 64, 32>}, {transform_indices = @transform_1, window_bounds = array<i64: 8, 1>}, {transform_indices = @transform_2, window_bounds = array<i64: 8, 32>}, {transform_indices = @transform_3, window_bounds = array<i64: 8, 1>}, {pipeline_mode = #tpu.pipeline_mode<synchronous>, transform_indices = @transform_4, window_bounds = array<i64: 32, 512>}, {pipeline_mode = #tpu.pipeline_mode<synchronous>, transform_indices = @transform_5, window_bounds = array<i64: 32, 512>}, {pipeline_mode = #tpu.pipeline_mode<synchronous>, transform_indices = @transform_6, window_bounds = array<i64: 1, 512>}, {pipeline_mode = #tpu.pipeline_mode<synchronous>, transform_indices = @transform_7, window_bounds = array<i64: 128, 512>}, {pipeline_mode = #tpu.pipeline_mode<synchronous>, transform_indices = @transform_8, window_bounds = array<i64: 1, 128>}, {pipeline_mode = #tpu.pipeline_mode<synchronous>, transform_indices = @transform_9, window_bounds = array<i64: 128, 128>}, {pipeline_mode = #tpu.pipeline_mode<synchronous>, transform_indices = @transform_10, window_bounds = array<i64: 1, 128>}, {transform_indices = @transform_11, window_bounds = array<i64: 8, 128>}]} {
    %c0 = arith.constant 0 : index
    %c0_0 = arith.constant 0 : index
    %0 = vector.load %arg1[%c0, %c0_0] : memref<64x32xf32, #tpu.memory_space<vmem>>, vector<64x32xf32>
    %c0_1 = arith.constant 0 : index
    %c0_2 = arith.constant 0 : index
    %1 = vector.load %arg5[%c0_1, %c0_2] : memref<32x512xf32, #tpu.memory_space<vmem>>, vector<32x512xf32>
    %cst = arith.constant dense<0.000000e+00> : vector<64x512xf32>
    %2 = tpu.matmul %0, %1, %cst {dimension_numbers = #tpu.dot_dimension_numbers<[1], [0], [0], [1], [0, 0, 1, 1], [], []>} : vector<64x32xf32>, vector<32x512xf32>, vector<64x512xf32> -> vector<64x512xf32>
    %c0_3 = arith.constant 0 : index
    %c0_4 = arith.constant 0 : index
    %3 = vector.load %arg13[%c0_3, %c0_4] : memref<64x512xf32, #tpu.memory_space<vmem>>, vector<64x512xf32>
    tpu.vector_store %arg13[%c0_3, %c0_4], %2 {strides = array<i32>} : memref<64x512xf32, #tpu.memory_space<vmem>>, vector<64x512xf32>,
    %c0_5 = arith.constant 0 : index
    %c0_6 = arith.constant 0 : index
    %4 = vector.load %arg3[%c0_5, %c0_6] : memref<8x32xf32, #tpu.memory_space<vmem>>, vector<8x32xf32>
    %c0_7 = arith.constant 0 : index
    %c0_8 = arith.constant 0 : index
    %5 = vector.load %arg6[%c0_7, %c0_8] : memref<32x512xf32, #tpu.memory_space<vmem>>, vector<32x512xf32>
    %cst_9 = arith.constant dense<0.000000e+00> : vector<8x512xf32>
    %6 = tpu.matmul %4, %5, %cst_9 {dimension_numbers = #tpu.dot_dimension_numbers<[1], [0], [0], [1], [0, 0, 1, 1], [], []>} : vector<8x32xf32>, vector<32x512xf32>, vector<8x512xf32> -> vector<8x512xf32>
    %c0_10 = arith.constant 0 : index
    %c0_11 = arith.constant 0 : index
    %7 = vector.load %arg7[%c0_10, %c0_11] : memref<1x512xf32, #tpu.memory_space<vmem>>, vector<1x512xf32>
    %8 = vector.broadcast %7 : vector<1x512xf32> to vector<8x512xf32>
    %9 = arith.addf %6, %8 : vector<8x512xf32>
    %c0_12 = arith.constant 0 : index
    %c0_13 = arith.constant 0 : index
    %10 = vector.load %arg2[%c0_12, %c0_13] : memref<8x1xi32, #tpu.memory_space<vmem>>, vector<8x1xi32>
    %c0_14 = arith.constant 0 : index
    %c0_15 = arith.constant 0 : index
    %11 = vector.load %arg4[%c0_14, %c0_15] : memref<8x1xf32, #tpu.memory_space<vmem>>, vector<8x1xf32>
    %c0_16 = arith.constant 0 : index
    %c0_17 = arith.constant 0 : index
    %12 = vector.load %arg9[%c0_16, %c0_17] : memref<1x128xf32, #tpu.memory_space<vmem>>, vector<1x128xf32>
    %cst_18 = arith.constant 0.000000e+00 : f32
    %13 = vector.broadcast %cst_18 : f32 to vector<8x128xf32>
    %cst_19 = arith.constant 0.000000e+00 : f32
    %14 = vector.broadcast %cst_19 : f32 to vector<8x128xf32>
    %cst_20 = arith.constant 0xFF800000 : f32
    %15 = vector.broadcast %cst_20 : f32 to vector<8x1xf32>
    %cst_21 = arith.constant 0.000000e+00 : f32
    %16 = vector.broadcast %cst_21 : f32 to vector<8x1xf32>
    %cst_22 = arith.constant 0.000000e+00 : f32
    %17 = vector.broadcast %cst_22 : f32 to vector<8x128xf32>
    %c0_i32 = arith.constant 0 : i32
    %c8_i32 = arith.constant 8 : i32
    %18 = arith.muli %c0_i32, %c8_i32 : i32
    %19 = tpu.assume_multiple %18, 8 : i32
    %20 = arith.index_cast %19 : i32 to index
    %c0_23 = arith.constant 0 : index
    %21 = vector.load %arg13[%20, %c0_23] : memref<64x512xf32, #tpu.memory_space<vmem>>, vector<8x512xf32>
    %22 = arith.addf %21, %9 : vector<8x512xf32>
    %c0_24 = arith.constant 0 : index
    %c0_25 = arith.constant 0 : index
    %23 = vector.load %arg8[%c0_24, %c0_25] : memref<128x512xf32, #tpu.memory_space<vmem>>, vector<128x512xf32>
    %cst_26 = arith.constant dense<0.000000e+00> : vector<8x512xf32>
    %24 = tpu.matmul %13, %23, %cst_26 {dimension_numbers = #tpu.dot_dimension_numbers<[1], [0], [0], [1], [0, 0, 1, 1], [], []>} : vector<8x128xf32>, vector<128x512xf32>, vector<8x512xf32> -> vector<8x512xf32>
    %25 = arith.addf %22, %24 : vector<8x512xf32>
    %26 = vector.extract_strided_slice %25 {offsets = [0, 0], sizes = [8, 128], strides = [1, 1]} : vector<8x512xf32> to vector<8x128xf32>
    %27 = arith.negf %26 : vector<8x128xf32>
    %28 = math.exp %27 : vector<8x128xf32>
    %cst_27 = arith.constant 1.000000e+00 : f32
    %29 = vector.broadcast %cst_27 : f32 to vector<8x128xf32>
    %30 = arith.addf %29, %28 : vector<8x128xf32>
    %31 = arith.divf %29, %30 : vector<8x128xf32>
    %32 = vector.extract_strided_slice %25 {offsets = [0, 128], sizes = [8, 128], strides = [1, 1]} : vector<8x512xf32> to vector<8x128xf32>
    %33 = arith.negf %32 : vector<8x128xf32>
    %34 = math.exp %33 : vector<8x128xf32>
    %cst_28 = arith.constant 1.000000e+00 : f32
    %35 = vector.broadcast %cst_28 : f32 to vector<8x128xf32>
    %36 = arith.addf %35, %34 : vector<8x128xf32>
    %37 = arith.divf %35, %36 : vector<8x128xf32>
    %38 = vector.extract_strided_slice %25 {offsets = [0, 256], sizes = [8, 128], strides = [1, 1]} : vector<8x512xf32> to vector<8x128xf32>
    %39 = math.tanh %38 : vector<8x128xf32>
    %40 = vector.extract_strided_slice %25 {offsets = [0, 384], sizes = [8, 128], strides = [1, 1]} : vector<8x512xf32> to vector<8x128xf32>
    %41 = arith.negf %40 : vector<8x128xf32>
    %42 = math.exp %41 : vector<8x128xf32>
    %cst_29 = arith.constant 1.000000e+00 : f32
    %43 = vector.broadcast %cst_29 : f32 to vector<8x128xf32>
    %44 = arith.addf %43, %42 : vector<8x128xf32>
    %45 = arith.divf %43, %44 : vector<8x128xf32>
    %46 = arith.mulf %37, %14 : vector<8x128xf32>
    %47 = arith.mulf %31, %39 : vector<8x128xf32>
    %48 = arith.addf %46, %47 : vector<8x128xf32>
    %49 = math.tanh %48 : vector<8x128xf32>
    %50 = arith.mulf %45, %49 : vector<8x128xf32>
    %51 = vector.broadcast %c0_i32 : i32 to vector<8x1xi32>
    %52 = arith.cmpi slt, %51, %10 : vector<8x1xi32>
    %53 = vector.shape_cast %52 : vector<8x1xi1> to vector<8x1xi1>
    %54 = vector.broadcast %53 : vector<8x1xi1> to vector<8x128xi1>
    %55 = arith.select %54, %48, %14 : vector<8x128xi1>, vector<8x128xf32>
    %56 = vector.shape_cast %52 : vector<8x1xi1> to vector<8x1xi1>
    %57 = vector.broadcast %56 : vector<8x1xi1> to vector<8x128xi1>
    %58 = arith.select %57, %50, %13 : vector<8x128xi1>, vector<8x128xf32>
    %cst_30 = arith.constant 0.000000e+00 : f32
    %59 = vector.broadcast %cst_30 : f32 to vector<8x128xf32>
    %60 = vector.shape_cast %52 : vector<8x1xi1> to vector<8x1xi1>
    %61 = vector.broadcast %60 : vector<8x1xi1> to vector<8x128xi1>
    %62 = arith.select %61, %50, %59 : vector<8x128xi1>, vector<8x128xf32>
    %63 = vector.broadcast %12 : vector<1x128xf32> to vector<8x128xf32>
    %64 = arith.mulf %62, %63 : vector<8x128xf32>
    %cst_31 = arith.constant dense<0.000000e+00> : vector<8xf32>
    %65 = vector.multi_reduction <add>, %64, %cst_31 [1] : vector<8x128xf32> to vector<8xf32>
    %66 = vector.shape_cast %65 : vector<8xf32> to vector<8x1xf32>
    %67 = arith.addf %66, %11 : vector<8x1xf32>
    %68 = arith.maximumf %15, %67 : vector<8x1xf32>
    %69 = arith.subf %15, %68 : vector<8x1xf32>
    %70 = math.exp %69 : vector<8x1xf32>
    %71 = arith.subf %67, %68 : vector<8x1xf32>
    %72 = math.exp %71 : vector<8x1xf32>
    %73 = arith.mulf %70, %16 : vector<8x1xf32>
    %74 = arith.addf %73, %72 : vector<8x1xf32>
    %75 = vector.broadcast %70 : vector<8x1xf32> to vector<8x128xf32>
    %76 = arith.mulf %75, %17 : vector<8x128xf32>
    %77 = vector.broadcast %72 : vector<8x1xf32> to vector<8x128xf32>
    %78 = arith.mulf %77, %62 : vector<8x128xf32>
    %79 = arith.addf %76, %78 : vector<8x128xf32>
    %c1_i32 = arith.constant 1 : i32
    %c8_i32_32 = arith.constant 8 : i32
    %80 = arith.muli %c1_i32, %c8_i32_32 : i32
    %81 = tpu.assume_multiple %80, 8 : i32
    %82 = arith.index_cast %81 : i32 to index
    %c0_33 = arith.constant 0 : index
    %83 = vector.load %arg13[%82, %c0_33] : memref<64x512xf32, #tpu.memory_space<vmem>>, vector<8x512xf32>
    %84 = arith.addf %83, %9 : vector<8x512xf32>
    %c0_34 = arith.constant 0 : index
    %c0_35 = arith.constant 0 : index
    %85 = vector.load %arg8[%c0_34, %c0_35] : memref<128x512xf32, #tpu.memory_space<vmem>>, vector<128x512xf32>
    %cst_36 = arith.constant dense<0.000000e+00> : vector<8x512xf32>
    %86 = tpu.matmul %58, %85, %cst_36 {dimension_numbers = #tpu.dot_dimension_numbers<[1], [0], [0], [1], [0, 0, 1, 1], [], []>} : vector<8x128xf32>, vector<128x512xf32>, vector<8x512xf32> -> vector<8x512xf32>
    %87 = arith.addf %84, %86 : vector<8x512xf32>
    %88 = vector.extract_strided_slice %87 {offsets = [0, 0], sizes = [8, 128], strides = [1, 1]} : vector<8x512xf32> to vector<8x128xf32>
    %89 = arith.negf %88 : vector<8x128xf32>
    %90 = math.exp %89 : vector<8x128xf32>
    %cst_37 = arith.constant 1.000000e+00 : f32
    %91 = vector.broadcast %cst_37 : f32 to vector<8x128xf32>
    %92 = arith.addf %91, %90 : vector<8x128xf32>
    %93 = arith.divf %91, %92 : vector<8x128xf32>
    %94 = vector.extract_strided_slice %87 {offsets = [0, 128], sizes = [8, 128], strides = [1, 1]} : vector<8x512xf32> to vector<8x128xf32>
    %95 = arith.negf %94 : vector<8x128xf32>
    %96 = math.exp %95 : vector<8x128xf32>
    %cst_38 = arith.constant 1.000000e+00 : f32
    %97 = vector.broadcast %cst_38 : f32 to vector<8x128xf32>
    %98 = arith.addf %97, %96 : vector<8x128xf32>
    %99 = arith.divf %97, %98 : vector<8x128xf32>
    %100 = vector.extract_strided_slice %87 {offsets = [0, 256], sizes = [8, 128], strides = [1, 1]} : vector<8x512xf32> to vector<8x128xf32>
    %101 = math.tanh %100 : vector<8x128xf32>
    %102 = vector.extract_strided_slice %87 {offsets = [0, 384], sizes = [8, 128], strides = [1, 1]} : vector<8x512xf32> to vector<8x128xf32>
    %103 = arith.negf %102 : vector<8x128xf32>
    %104 = math.exp %103 : vector<8x128xf32>
    %cst_39 = arith.constant 1.000000e+00 : f32
    %105 = vector.broadcast %cst_39 : f32 to vector<8x128xf32>
    %106 = arith.addf %105, %104 : vector<8x128xf32>
    %107 = arith.divf %105, %106 : vector<8x128xf32>
    %108 = arith.mulf %99, %55 : vector<8x128xf32>
    %109 = arith.mulf %93, %101 : vector<8x128xf32>
    %110 = arith.addf %108, %109 : vector<8x128xf32>
    %111 = math.tanh %110 : vector<8x128xf32>
    %112 = arith.mulf %107, %111 : vector<8x128xf32>
    %113 = vector.broadcast %c1_i32 : i32 to vector<8x1xi32>
    %114 = arith.cmpi slt, %113, %10 : vector<8x1xi32>
    %115 = vector.shape_cast %114 : vector<8x1xi1> to vector<8x1xi1>
    %116 = vector.broadcast %115 : vector<8x1xi1> to vector<8x128xi1>
    %117 = arith.select %116, %110, %55 : vector<8x128xi1>, vector<8x128xf32>
    %118 = vector.shape_cast %114 : vector<8x1xi1> to vector<8x1xi1>
    %119 = vector.broadcast %118 : vector<8x1xi1> to vector<8x128xi1>
    %120 = arith.select %119, %112, %58 : vector<8x128xi1>, vector<8x128xf32>
    %cst_40 = arith.constant 0.000000e+00 : f32
    %121 = vector.broadcast %cst_40 : f32 to vector<8x128xf32>
    %122 = vector.shape_cast %114 : vector<8x1xi1> to vector<8x1xi1>
    %123 = vector.broadcast %122 : vector<8x1xi1> to vector<8x128xi1>
    %124 = arith.select %123, %112, %121 : vector<8x128xi1>, vector<8x128xf32>
    %125 = vector.broadcast %12 : vector<1x128xf32> to vector<8x128xf32>
    %126 = arith.mulf %124, %125 : vector<8x128xf32>
    %cst_41 = arith.constant dense<0.000000e+00> : vector<8xf32>
    %127 = vector.multi_reduction <add>, %126, %cst_41 [1] : vector<8x128xf32> to vector<8xf32>
    %128 = vector.shape_cast %127 : vector<8xf32> to vector<8x1xf32>
    %129 = arith.addf %128, %11 : vector<8x1xf32>
    %130 = arith.maximumf %68, %129 : vector<8x1xf32>
    %131 = arith.subf %68, %130 : vector<8x1xf32>
    %132 = math.exp %131 : vector<8x1xf32>
    %133 = arith.subf %129, %130 : vector<8x1xf32>
    %134 = math.exp %133 : vector<8x1xf32>
    %135 = arith.mulf %132, %74 : vector<8x1xf32>
    %136 = arith.addf %135, %134 : vector<8x1xf32>
    %137 = vector.broadcast %132 : vector<8x1xf32> to vector<8x128xf32>
    %138 = arith.mulf %137, %79 : vector<8x128xf32>
    %139 = vector.broadcast %134 : vector<8x1xf32> to vector<8x128xf32>
    %140 = arith.mulf %139, %124 : vector<8x128xf32>
    %141 = arith.addf %138, %140 : vector<8x128xf32>
    %c2_i32 = arith.constant 2 : i32
    %c8_i32_42 = arith.constant 8 : i32
    %142 = arith.muli %c2_i32, %c8_i32_42 : i32
    %143 = tpu.assume_multiple %142, 8 : i32
    %144 = arith.index_cast %143 : i32 to index
    %c0_43 = arith.constant 0 : index
    %145 = vector.load %arg13[%144, %c0_43] : memref<64x512xf32, #tpu.memory_space<vmem>>, vector<8x512xf32>
    %146 = arith.addf %145, %9 : vector<8x512xf32>
    %c0_44 = arith.constant 0 : index
    %c0_45 = arith.constant 0 : index
    %147 = vector.load %arg8[%c0_44, %c0_45] : memref<128x512xf32, #tpu.memory_space<vmem>>, vector<128x512xf32>
    %cst_46 = arith.constant dense<0.000000e+00> : vector<8x512xf32>
    %148 = tpu.matmul %120, %147, %cst_46 {dimension_numbers = #tpu.dot_dimension_numbers<[1], [0], [0], [1], [0, 0, 1, 1], [], []>} : vector<8x128xf32>, vector<128x512xf32>, vector<8x512xf32> -> vector<8x512xf32>
    %149 = arith.addf %146, %148 : vector<8x512xf32>
    %150 = vector.extract_strided_slice %149 {offsets = [0, 0], sizes = [8, 128], strides = [1, 1]} : vector<8x512xf32> to vector<8x128xf32>
    %151 = arith.negf %150 : vector<8x128xf32>
    %152 = math.exp %151 : vector<8x128xf32>
    %cst_47 = arith.constant 1.000000e+00 : f32
    %153 = vector.broadcast %cst_47 : f32 to vector<8x128xf32>
    %154 = arith.addf %153, %152 : vector<8x128xf32>
    %155 = arith.divf %153, %154 : vector<8x128xf32>
    %156 = vector.extract_strided_slice %149 {offsets = [0, 128], sizes = [8, 128], strides = [1, 1]} : vector<8x512xf32> to vector<8x128xf32>
    %157 = arith.negf %156 : vector<8x128xf32>
    %158 = math.exp %157 : vector<8x128xf32>
    %cst_48 = arith.constant 1.000000e+00 : f32
    %159 = vector.broadcast %cst_48 : f32 to vector<8x128xf32>
    %160 = arith.addf %159, %158 : vector<8x128xf32>
    %161 = arith.divf %159, %160 : vector<8x128xf32>
    %162 = vector.extract_strided_slice %149 {offsets = [0, 256], sizes = [8, 128], strides = [1, 1]} : vector<8x512xf32> to vector<8x128xf32>
    %163 = math.tanh %162 : vector<8x128xf32>
    %164 = vector.extract_strided_slice %149 {offsets = [0, 384], sizes = [8, 128], strides = [1, 1]} : vector<8x512xf32> to vector<8x128xf32>
    %165 = arith.negf %164 : vector<8x128xf32>
    %166 = math.exp %165 : vector<8x128xf32>
    %cst_49 = arith.constant 1.000000e+00 : f32
    %167 = vector.broadcast %cst_49 : f32 to vector<8x128xf32>
    %168 = arith.addf %167, %166 : vector<8x128xf32>
    %169 = arith.divf %167, %168 : vector<8x128xf32>
    %170 = arith.mulf %161, %117 : vector<8x128xf32>
    %171 = arith.mulf %155, %163 : vector<8x128xf32>
    %172 = arith.addf %170, %171 : vector<8x128xf32>
    %173 = math.tanh %172 : vector<8x128xf32>
    %174 = arith.mulf %169, %173 : vector<8x128xf32>
    %175 = vector.broadcast %c2_i32 : i32 to vector<8x1xi32>
    %176 = arith.cmpi slt, %175, %10 : vector<8x1xi32>
    %177 = vector.shape_cast %176 : vector<8x1xi1> to vector<8x1xi1>
    %178 = vector.broadcast %177 : vector<8x1xi1> to vector<8x128xi1>
    %179 = arith.select %178, %172, %117 : vector<8x128xi1>, vector<8x128xf32>
    %180 = vector.shape_cast %176 : vector<8x1xi1> to vector<8x1xi1>
    %181 = vector.broadcast %180 : vector<8x1xi1> to vector<8x128xi1>
    %182 = arith.select %181, %174, %120 : vector<8x128xi1>, vector<8x128xf32>
    %cst_50 = arith.constant 0.000000e+00 : f32
    %183 = vector.broadcast %cst_50 : f32 to vector<8x128xf32>
    %184 = vector.shape_cast %176 : vector<8x1xi1> to vector<8x1xi1>
    %185 = vector.broadcast %184 : vector<8x1xi1> to vector<8x128xi1>
    %186 = arith.select %185, %174, %183 : vector<8x128xi1>, vector<8x128xf32>
    %187 = vector.broadcast %12 : vector<1x128xf32> to vector<8x128xf32>
    %188 = arith.mulf %186, %187 : vector<8x128xf32>
    %cst_51 = arith.constant dense<0.000000e+00> : vector<8xf32>
    %189 = vector.multi_reduction <add>, %188, %cst_51 [1] : vector<8x128xf32> to vector<8xf32>
    %190 = vector.shape_cast %189 : vector<8xf32> to vector<8x1xf32>
    %191 = arith.addf %190, %11 : vector<8x1xf32>
    %192 = arith.maximumf %130, %191 : vector<8x1xf32>
    %193 = arith.subf %130, %192 : vector<8x1xf32>
    %194 = math.exp %193 : vector<8x1xf32>
    %195 = arith.subf %191, %192 : vector<8x1xf32>
    %196 = math.exp %195 : vector<8x1xf32>
    %197 = arith.mulf %194, %136 : vector<8x1xf32>
    %198 = arith.addf %197, %196 : vector<8x1xf32>
    %199 = vector.broadcast %194 : vector<8x1xf32> to vector<8x128xf32>
    %200 = arith.mulf %199, %141 : vector<8x128xf32>
    %201 = vector.broadcast %196 : vector<8x1xf32> to vector<8x128xf32>
    %202 = arith.mulf %201, %186 : vector<8x128xf32>
    %203 = arith.addf %200, %202 : vector<8x128xf32>
    %c3_i32 = arith.constant 3 : i32
    %c8_i32_52 = arith.constant 8 : i32
    %204 = arith.muli %c3_i32, %c8_i32_52 : i32
    %205 = tpu.assume_multiple %204, 8 : i32
    %206 = arith.index_cast %205 : i32 to index
    %c0_53 = arith.constant 0 : index
    %207 = vector.load %arg13[%206, %c0_53] : memref<64x512xf32, #tpu.memory_space<vmem>>, vector<8x512xf32>
    %208 = arith.addf %207, %9 : vector<8x512xf32>
    %c0_54 = arith.constant 0 : index
    %c0_55 = arith.constant 0 : index
    %209 = vector.load %arg8[%c0_54, %c0_55] : memref<128x512xf32, #tpu.memory_space<vmem>>, vector<128x512xf32>
    %cst_56 = arith.constant dense<0.000000e+00> : vector<8x512xf32>
    %210 = tpu.matmul %182, %209, %cst_56 {dimension_numbers = #tpu.dot_dimension_numbers<[1], [0], [0], [1], [0, 0, 1, 1], [], []>} : vector<8x128xf32>, vector<128x512xf32>, vector<8x512xf32> -> vector<8x512xf32>
    %211 = arith.addf %208, %210 : vector<8x512xf32>
    %212 = vector.extract_strided_slice %211 {offsets = [0, 0], sizes = [8, 128], strides = [1, 1]} : vector<8x512xf32> to vector<8x128xf32>
    %213 = arith.negf %212 : vector<8x128xf32>
    %214 = math.exp %213 : vector<8x128xf32>
    %cst_57 = arith.constant 1.000000e+00 : f32
    %215 = vector.broadcast %cst_57 : f32 to vector<8x128xf32>
    %216 = arith.addf %215, %214 : vector<8x128xf32>
    %217 = arith.divf %215, %216 : vector<8x128xf32>
    %218 = vector.extract_strided_slice %211 {offsets = [0, 128], sizes = [8, 128], strides = [1, 1]} : vector<8x512xf32> to vector<8x128xf32>
    %219 = arith.negf %218 : vector<8x128xf32>
    %220 = math.exp %219 : vector<8x128xf32>
    %cst_58 = arith.constant 1.000000e+00 : f32
    %221 = vector.broadcast %cst_58 : f32 to vector<8x128xf32>
    %222 = arith.addf %221, %220 : vector<8x128xf32>
    %223 = arith.divf %221, %222 : vector<8x128xf32>
    %224 = vector.extract_strided_slice %211 {offsets = [0, 256], sizes = [8, 128], strides = [1, 1]} : vector<8x512xf32> to vector<8x128xf32>
    %225 = math.tanh %224 : vector<8x128xf32>
    %226 = vector.extract_strided_slice %211 {offsets = [0, 384], sizes = [8, 128], strides = [1, 1]} : vector<8x512xf32> to vector<8x128xf32>
    %227 = arith.negf %226 : vector<8x128xf32>
    %228 = math.exp %227 : vector<8x128xf32>
    %cst_59 = arith.constant 1.000000e+00 : f32
    %229 = vector.broadcast %cst_59 : f32 to vector<8x128xf32>
    %230 = arith.addf %229, %228 : vector<8x128xf32>
    %231 = arith.divf %229, %230 : vector<8x128xf32>
    %232 = arith.mulf %223, %179 : vector<8x128xf32>
    %233 = arith.mulf %217, %225 : vector<8x128xf32>
    %234 = arith.addf %232, %233 : vector<8x128xf32>
    %235 = math.tanh %234 : vector<8x128xf32>
    %236 = arith.mulf %231, %235 : vector<8x128xf32>
    %237 = vector.broadcast %c3_i32 : i32 to vector<8x1xi32>
    %238 = arith.cmpi slt, %237, %10 : vector<8x1xi32>
    %239 = vector.shape_cast %238 : vector<8x1xi1> to vector<8x1xi1>
    %240 = vector.broadcast %239 : vector<8x1xi1> to vector<8x128xi1>
    %241 = arith.select %240, %234, %179 : vector<8x128xi1>, vector<8x128xf32>
    %242 = vector.shape_cast %238 : vector<8x1xi1> to vector<8x1xi1>
    %243 = vector.broadcast %242 : vector<8x1xi1> to vector<8x128xi1>
    %244 = arith.select %243, %236, %182 : vector<8x128xi1>, vector<8x128xf32>
    %cst_60 = arith.constant 0.000000e+00 : f32
    %245 = vector.broadcast %cst_60 : f32 to vector<8x128xf32>
    %246 = vector.shape_cast %238 : vector<8x1xi1> to vector<8x1xi1>
    %247 = vector.broadcast %246 : vector<8x1xi1> to vector<8x128xi1>
    %248 = arith.select %247, %236, %245 : vector<8x128xi1>, vector<8x128xf32>
    %249 = vector.broadcast %12 : vector<1x128xf32> to vector<8x128xf32>
    %250 = arith.mulf %248, %249 : vector<8x128xf32>
    %cst_61 = arith.constant dense<0.000000e+00> : vector<8xf32>
    %251 = vector.multi_reduction <add>, %250, %cst_61 [1] : vector<8x128xf32> to vector<8xf32>
    %252 = vector.shape_cast %251 : vector<8xf32> to vector<8x1xf32>
    %253 = arith.addf %252, %11 : vector<8x1xf32>
    %254 = arith.maximumf %192, %253 : vector<8x1xf32>
    %255 = arith.subf %192, %254 : vector<8x1xf32>
    %256 = math.exp %255 : vector<8x1xf32>
    %257 = arith.subf %253, %254 : vector<8x1xf32>
    %258 = math.exp %257 : vector<8x1xf32>
    %259 = arith.mulf %256, %198 : vector<8x1xf32>
    %260 = arith.addf %259, %258 : vector<8x1xf32>
    %261 = vector.broadcast %256 : vector<8x1xf32> to vector<8x128xf32>
    %262 = arith.mulf %261, %203 : vector<8x128xf32>
    %263 = vector.broadcast %258 : vector<8x1xf32> to vector<8x128xf32>
    %264 = arith.mulf %263, %248 : vector<8x128xf32>
    %265 = arith.addf %262, %264 : vector<8x128xf32>
    %c4_i32 = arith.constant 4 : i32
    %c8_i32_62 = arith.constant 8 : i32
    %266 = arith.muli %c4_i32, %c8_i32_62 : i32
    %267 = tpu.assume_multiple %266, 8 : i32
    %268 = arith.index_cast %267 : i32 to index
    %c0_63 = arith.constant 0 : index
    %269 = vector.load %arg13[%268, %c0_63] : memref<64x512xf32, #tpu.memory_space<vmem>>, vector<8x512xf32>
    %270 = arith.addf %269, %9 : vector<8x512xf32>
    %c0_64 = arith.constant 0 : index
    %c0_65 = arith.constant 0 : index
    %271 = vector.load %arg8[%c0_64, %c0_65] : memref<128x512xf32, #tpu.memory_space<vmem>>, vector<128x512xf32>
    %cst_66 = arith.constant dense<0.000000e+00> : vector<8x512xf32>
    %272 = tpu.matmul %244, %271, %cst_66 {dimension_numbers = #tpu.dot_dimension_numbers<[1], [0], [0], [1], [0, 0, 1, 1], [], []>} : vector<8x128xf32>, vector<128x512xf32>, vector<8x512xf32> -> vector<8x512xf32>
    %273 = arith.addf %270, %272 : vector<8x512xf32>
    %274 = vector.extract_strided_slice %273 {offsets = [0, 0], sizes = [8, 128], strides = [1, 1]} : vector<8x512xf32> to vector<8x128xf32>
    %275 = arith.negf %274 : vector<8x128xf32>
    %276 = math.exp %275 : vector<8x128xf32>
    %cst_67 = arith.constant 1.000000e+00 : f32
    %277 = vector.broadcast %cst_67 : f32 to vector<8x128xf32>
    %278 = arith.addf %277, %276 : vector<8x128xf32>
    %279 = arith.divf %277, %278 : vector<8x128xf32>
    %280 = vector.extract_strided_slice %273 {offsets = [0, 128], sizes = [8, 128], strides = [1, 1]} : vector<8x512xf32> to vector<8x128xf32>
    %281 = arith.negf %280 : vector<8x128xf32>
    %282 = math.exp %281 : vector<8x128xf32>
    %cst_68 = arith.constant 1.000000e+00 : f32
    %283 = vector.broadcast %cst_68 : f32 to vector<8x128xf32>
    %284 = arith.addf %283, %282 : vector<8x128xf32>
    %285 = arith.divf %283, %284 : vector<8x128xf32>
    %286 = vector.extract_strided_slice %273 {offsets = [0, 256], sizes = [8, 128], strides = [1, 1]} : vector<8x512xf32> to vector<8x128xf32>
    %287 = math.tanh %286 : vector<8x128xf32>
    %288 = vector.extract_strided_slice %273 {offsets = [0, 384], sizes = [8, 128], strides = [1, 1]} : vector<8x512xf32> to vector<8x128xf32>
    %289 = arith.negf %288 : vector<8x128xf32>
    %290 = math.exp %289 : vector<8x128xf32>
    %cst_69 = arith.constant 1.000000e+00 : f32
    %291 = vector.broadcast %cst_69 : f32 to vector<8x128xf32>
    %292 = arith.addf %291, %290 : vector<8x128xf32>
    %293 = arith.divf %291, %292 : vector<8x128xf32>
    %294 = arith.mulf %285, %241 : vector<8x128xf32>
    %295 = arith.mulf %279, %287 : vector<8x128xf32>
    %296 = arith.addf %294, %295 : vector<8x128xf32>
    %297 = math.tanh %296 : vector<8x128xf32>
    %298 = arith.mulf %293, %297 : vector<8x128xf32>
    %299 = vector.broadcast %c4_i32 : i32 to vector<8x1xi32>
    %300 = arith.cmpi slt, %299, %10 : vector<8x1xi32>
    %301 = vector.shape_cast %300 : vector<8x1xi1> to vector<8x1xi1>
    %302 = vector.broadcast %301 : vector<8x1xi1> to vector<8x128xi1>
    %303 = arith.select %302, %296, %241 : vector<8x128xi1>, vector<8x128xf32>
    %304 = vector.shape_cast %300 : vector<8x1xi1> to vector<8x1xi1>
    %305 = vector.broadcast %304 : vector<8x1xi1> to vector<8x128xi1>
    %306 = arith.select %305, %298, %244 : vector<8x128xi1>, vector<8x128xf32>
    %cst_70 = arith.constant 0.000000e+00 : f32
    %307 = vector.broadcast %cst_70 : f32 to vector<8x128xf32>
    %308 = vector.shape_cast %300 : vector<8x1xi1> to vector<8x1xi1>
    %309 = vector.broadcast %308 : vector<8x1xi1> to vector<8x128xi1>
    %310 = arith.select %309, %298, %307 : vector<8x128xi1>, vector<8x128xf32>
    %311 = vector.broadcast %12 : vector<1x128xf32> to vector<8x128xf32>
    %312 = arith.mulf %310, %311 : vector<8x128xf32>
    %cst_71 = arith.constant dense<0.000000e+00> : vector<8xf32>
    %313 = vector.multi_reduction <add>, %312, %cst_71 [1] : vector<8x128xf32> to vector<8xf32>
    %314 = vector.shape_cast %313 : vector<8xf32> to vector<8x1xf32>
    %315 = arith.addf %314, %11 : vector<8x1xf32>
    %316 = arith.maximumf %254, %315 : vector<8x1xf32>
    %317 = arith.subf %254, %316 : vector<8x1xf32>
    %318 = math.exp %317 : vector<8x1xf32>
    %319 = arith.subf %315, %316 : vector<8x1xf32>
    %320 = math.exp %319 : vector<8x1xf32>
    %321 = arith.mulf %318, %260 : vector<8x1xf32>
    %322 = arith.addf %321, %320 : vector<8x1xf32>
    %323 = vector.broadcast %318 : vector<8x1xf32> to vector<8x128xf32>
    %324 = arith.mulf %323, %265 : vector<8x128xf32>
    %325 = vector.broadcast %320 : vector<8x1xf32> to vector<8x128xf32>
    %326 = arith.mulf %325, %310 : vector<8x128xf32>
    %327 = arith.addf %324, %326 : vector<8x128xf32>
    %c5_i32 = arith.constant 5 : i32
    %c8_i32_72 = arith.constant 8 : i32
    %328 = arith.muli %c5_i32, %c8_i32_72 : i32
    %329 = tpu.assume_multiple %328, 8 : i32
    %330 = arith.index_cast %329 : i32 to index
    %c0_73 = arith.constant 0 : index
    %331 = vector.load %arg13[%330, %c0_73] : memref<64x512xf32, #tpu.memory_space<vmem>>, vector<8x512xf32>
    %332 = arith.addf %331, %9 : vector<8x512xf32>
    %c0_74 = arith.constant 0 : index
    %c0_75 = arith.constant 0 : index
    %333 = vector.load %arg8[%c0_74, %c0_75] : memref<128x512xf32, #tpu.memory_space<vmem>>, vector<128x512xf32>
    %cst_76 = arith.constant dense<0.000000e+00> : vector<8x512xf32>
    %334 = tpu.matmul %306, %333, %cst_76 {dimension_numbers = #tpu.dot_dimension_numbers<[1], [0], [0], [1], [0, 0, 1, 1], [], []>} : vector<8x128xf32>, vector<128x512xf32>, vector<8x512xf32> -> vector<8x512xf32>
    %335 = arith.addf %332, %334 : vector<8x512xf32>
    %336 = vector.extract_strided_slice %335 {offsets = [0, 0], sizes = [8, 128], strides = [1, 1]} : vector<8x512xf32> to vector<8x128xf32>
    %337 = arith.negf %336 : vector<8x128xf32>
    %338 = math.exp %337 : vector<8x128xf32>
    %cst_77 = arith.constant 1.000000e+00 : f32
    %339 = vector.broadcast %cst_77 : f32 to vector<8x128xf32>
    %340 = arith.addf %339, %338 : vector<8x128xf32>
    %341 = arith.divf %339, %340 : vector<8x128xf32>
    %342 = vector.extract_strided_slice %335 {offsets = [0, 128], sizes = [8, 128], strides = [1, 1]} : vector<8x512xf32> to vector<8x128xf32>
    %343 = arith.negf %342 : vector<8x128xf32>
    %344 = math.exp %343 : vector<8x128xf32>
    %cst_78 = arith.constant 1.000000e+00 : f32
    %345 = vector.broadcast %cst_78 : f32 to vector<8x128xf32>
    %346 = arith.addf %345, %344 : vector<8x128xf32>
    %347 = arith.divf %345, %346 : vector<8x128xf32>
    %348 = vector.extract_strided_slice %335 {offsets = [0, 256], sizes = [8, 128], strides = [1, 1]} : vector<8x512xf32> to vector<8x128xf32>
    %349 = math.tanh %348 : vector<8x128xf32>
    %350 = vector.extract_strided_slice %335 {offsets = [0, 384], sizes = [8, 128], strides = [1, 1]} : vector<8x512xf32> to vector<8x128xf32>
    %351 = arith.negf %350 : vector<8x128xf32>
    %352 = math.exp %351 : vector<8x128xf32>
    %cst_79 = arith.constant 1.000000e+00 : f32
    %353 = vector.broadcast %cst_79 : f32 to vector<8x128xf32>
    %354 = arith.addf %353, %352 : vector<8x128xf32>
    %355 = arith.divf %353, %354 : vector<8x128xf32>
    %356 = arith.mulf %347, %303 : vector<8x128xf32>
    %357 = arith.mulf %341, %349 : vector<8x128xf32>
    %358 = arith.addf %356, %357 : vector<8x128xf32>
    %359 = math.tanh %358 : vector<8x128xf32>
    %360 = arith.mulf %355, %359 : vector<8x128xf32>
    %361 = vector.broadcast %c5_i32 : i32 to vector<8x1xi32>
    %362 = arith.cmpi slt, %361, %10 : vector<8x1xi32>
    %363 = vector.shape_cast %362 : vector<8x1xi1> to vector<8x1xi1>
    %364 = vector.broadcast %363 : vector<8x1xi1> to vector<8x128xi1>
    %365 = arith.select %364, %358, %303 : vector<8x128xi1>, vector<8x128xf32>
    %366 = vector.shape_cast %362 : vector<8x1xi1> to vector<8x1xi1>
    %367 = vector.broadcast %366 : vector<8x1xi1> to vector<8x128xi1>
    %368 = arith.select %367, %360, %306 : vector<8x128xi1>, vector<8x128xf32>
    %cst_80 = arith.constant 0.000000e+00 : f32
    %369 = vector.broadcast %cst_80 : f32 to vector<8x128xf32>
    %370 = vector.shape_cast %362 : vector<8x1xi1> to vector<8x1xi1>
    %371 = vector.broadcast %370 : vector<8x1xi1> to vector<8x128xi1>
    %372 = arith.select %371, %360, %369 : vector<8x128xi1>, vector<8x128xf32>
    %373 = vector.broadcast %12 : vector<1x128xf32> to vector<8x128xf32>
    %374 = arith.mulf %372, %373 : vector<8x128xf32>
    %cst_81 = arith.constant dense<0.000000e+00> : vector<8xf32>
    %375 = vector.multi_reduction <add>, %374, %cst_81 [1] : vector<8x128xf32> to vector<8xf32>
    %376 = vector.shape_cast %375 : vector<8xf32> to vector<8x1xf32>
    %377 = arith.addf %376, %11 : vector<8x1xf32>
    %378 = arith.maximumf %316, %377 : vector<8x1xf32>
    %379 = arith.subf %316, %378 : vector<8x1xf32>
    %380 = math.exp %379 : vector<8x1xf32>
    %381 = arith.subf %377, %378 : vector<8x1xf32>
    %382 = math.exp %381 : vector<8x1xf32>
    %383 = arith.mulf %380, %322 : vector<8x1xf32>
    %384 = arith.addf %383, %382 : vector<8x1xf32>
    %385 = vector.broadcast %380 : vector<8x1xf32> to vector<8x128xf32>
    %386 = arith.mulf %385, %327 : vector<8x128xf32>
    %387 = vector.broadcast %382 : vector<8x1xf32> to vector<8x128xf32>
    %388 = arith.mulf %387, %372 : vector<8x128xf32>
    %389 = arith.addf %386, %388 : vector<8x128xf32>
    %c6_i32 = arith.constant 6 : i32
    %c8_i32_82 = arith.constant 8 : i32
    %390 = arith.muli %c6_i32, %c8_i32_82 : i32
    %391 = tpu.assume_multiple %390, 8 : i32
    %392 = arith.index_cast %391 : i32 to index
    %c0_83 = arith.constant 0 : index
    %393 = vector.load %arg13[%392, %c0_83] : memref<64x512xf32, #tpu.memory_space<vmem>>, vector<8x512xf32>
    %394 = arith.addf %393, %9 : vector<8x512xf32>
    %c0_84 = arith.constant 0 : index
    %c0_85 = arith.constant 0 : index
    %395 = vector.load %arg8[%c0_84, %c0_85] : memref<128x512xf32, #tpu.memory_space<vmem>>, vector<128x512xf32>
    %cst_86 = arith.constant dense<0.000000e+00> : vector<8x512xf32>
    %396 = tpu.matmul %368, %395, %cst_86 {dimension_numbers = #tpu.dot_dimension_numbers<[1], [0], [0], [1], [0, 0, 1, 1], [], []>} : vector<8x128xf32>, vector<128x512xf32>, vector<8x512xf32> -> vector<8x512xf32>
    %397 = arith.addf %394, %396 : vector<8x512xf32>
    %398 = vector.extract_strided_slice %397 {offsets = [0, 0], sizes = [8, 128], strides = [1, 1]} : vector<8x512xf32> to vector<8x128xf32>
    %399 = arith.negf %398 : vector<8x128xf32>
    %400 = math.exp %399 : vector<8x128xf32>
    %cst_87 = arith.constant 1.000000e+00 : f32
    %401 = vector.broadcast %cst_87 : f32 to vector<8x128xf32>
    %402 = arith.addf %401, %400 : vector<8x128xf32>
    %403 = arith.divf %401, %402 : vector<8x128xf32>
    %404 = vector.extract_strided_slice %397 {offsets = [0, 128], sizes = [8, 128], strides = [1, 1]} : vector<8x512xf32> to vector<8x128xf32>
    %405 = arith.negf %404 : vector<8x128xf32>
    %406 = math.exp %405 : vector<8x128xf32>
    %cst_88 = arith.constant 1.000000e+00 : f32
    %407 = vector.broadcast %cst_88 : f32 to vector<8x128xf32>
    %408 = arith.addf %407, %406 : vector<8x128xf32>
    %409 = arith.divf %407, %408 : vector<8x128xf32>
    %410 = vector.extract_strided_slice %397 {offsets = [0, 256], sizes = [8, 128], strides = [1, 1]} : vector<8x512xf32> to vector<8x128xf32>
    %411 = math.tanh %410 : vector<8x128xf32>
    %412 = vector.extract_strided_slice %397 {offsets = [0, 384], sizes = [8, 128], strides = [1, 1]} : vector<8x512xf32> to vector<8x128xf32>
    %413 = arith.negf %412 : vector<8x128xf32>
    %414 = math.exp %413 : vector<8x128xf32>
    %cst_89 = arith.constant 1.000000e+00 : f32
    %415 = vector.broadcast %cst_89 : f32 to vector<8x128xf32>
    %416 = arith.addf %415, %414 : vector<8x128xf32>
    %417 = arith.divf %415, %416 : vector<8x128xf32>
    %418 = arith.mulf %409, %365 : vector<8x128xf32>
    %419 = arith.mulf %403, %411 : vector<8x128xf32>
    %420 = arith.addf %418, %419 : vector<8x128xf32>
    %421 = math.tanh %420 : vector<8x128xf32>
    %422 = arith.mulf %417, %421 : vector<8x128xf32>
    %423 = vector.broadcast %c6_i32 : i32 to vector<8x1xi32>
    %424 = arith.cmpi slt, %423, %10 : vector<8x1xi32>
    %425 = vector.shape_cast %424 : vector<8x1xi1> to vector<8x1xi1>
    %426 = vector.broadcast %425 : vector<8x1xi1> to vector<8x128xi1>
    %427 = arith.select %426, %420, %365 : vector<8x128xi1>, vector<8x128xf32>
    %428 = vector.shape_cast %424 : vector<8x1xi1> to vector<8x1xi1>
    %429 = vector.broadcast %428 : vector<8x1xi1> to vector<8x128xi1>
    %430 = arith.select %429, %422, %368 : vector<8x128xi1>, vector<8x128xf32>
    %cst_90 = arith.constant 0.000000e+00 : f32
    %431 = vector.broadcast %cst_90 : f32 to vector<8x128xf32>
    %432 = vector.shape_cast %424 : vector<8x1xi1> to vector<8x1xi1>
    %433 = vector.broadcast %432 : vector<8x1xi1> to vector<8x128xi1>
    %434 = arith.select %433, %422, %431 : vector<8x128xi1>, vector<8x128xf32>
    %435 = vector.broadcast %12 : vector<1x128xf32> to vector<8x128xf32>
    %436 = arith.mulf %434, %435 : vector<8x128xf32>
    %cst_91 = arith.constant dense<0.000000e+00> : vector<8xf32>
    %437 = vector.multi_reduction <add>, %436, %cst_91 [1] : vector<8x128xf32> to vector<8xf32>
    %438 = vector.shape_cast %437 : vector<8xf32> to vector<8x1xf32>
    %439 = arith.addf %438, %11 : vector<8x1xf32>
    %440 = arith.maximumf %378, %439 : vector<8x1xf32>
    %441 = arith.subf %378, %440 : vector<8x1xf32>
    %442 = math.exp %441 : vector<8x1xf32>
    %443 = arith.subf %439, %440 : vector<8x1xf32>
    %444 = math.exp %443 : vector<8x1xf32>
    %445 = arith.mulf %442, %384 : vector<8x1xf32>
    %446 = arith.addf %445, %444 : vector<8x1xf32>
    %447 = vector.broadcast %442 : vector<8x1xf32> to vector<8x128xf32>
    %448 = arith.mulf %447, %389 : vector<8x128xf32>
    %449 = vector.broadcast %444 : vector<8x1xf32> to vector<8x128xf32>
    %450 = arith.mulf %449, %434 : vector<8x128xf32>
    %451 = arith.addf %448, %450 : vector<8x128xf32>
    %c7_i32 = arith.constant 7 : i32
    %c8_i32_92 = arith.constant 8 : i32
    %452 = arith.muli %c7_i32, %c8_i32_92 : i32
    %453 = tpu.assume_multiple %452, 8 : i32
    %454 = arith.index_cast %453 : i32 to index
    %c0_93 = arith.constant 0 : index
    %455 = vector.load %arg13[%454, %c0_93] : memref<64x512xf32, #tpu.memory_space<vmem>>, vector<8x512xf32>
    %456 = arith.addf %455, %9 : vector<8x512xf32>
    %c0_94 = arith.constant 0 : index
    %c0_95 = arith.constant 0 : index
    %457 = vector.load %arg8[%c0_94, %c0_95] : memref<128x512xf32, #tpu.memory_space<vmem>>, vector<128x512xf32>
    %cst_96 = arith.constant dense<0.000000e+00> : vector<8x512xf32>
    %458 = tpu.matmul %430, %457, %cst_96 {dimension_numbers = #tpu.dot_dimension_numbers<[1], [0], [0], [1], [0, 0, 1, 1], [], []>} : vector<8x128xf32>, vector<128x512xf32>, vector<8x512xf32> -> vector<8x512xf32>
    %459 = arith.addf %456, %458 : vector<8x512xf32>
    %460 = vector.extract_strided_slice %459 {offsets = [0, 0], sizes = [8, 128], strides = [1, 1]} : vector<8x512xf32> to vector<8x128xf32>
    %461 = arith.negf %460 : vector<8x128xf32>
    %462 = math.exp %461 : vector<8x128xf32>
    %cst_97 = arith.constant 1.000000e+00 : f32
    %463 = vector.broadcast %cst_97 : f32 to vector<8x128xf32>
    %464 = arith.addf %463, %462 : vector<8x128xf32>
    %465 = arith.divf %463, %464 : vector<8x128xf32>
    %466 = vector.extract_strided_slice %459 {offsets = [0, 128], sizes = [8, 128], strides = [1, 1]} : vector<8x512xf32> to vector<8x128xf32>
    %467 = arith.negf %466 : vector<8x128xf32>
    %468 = math.exp %467 : vector<8x128xf32>
    %cst_98 = arith.constant 1.000000e+00 : f32
    %469 = vector.broadcast %cst_98 : f32 to vector<8x128xf32>
    %470 = arith.addf %469, %468 : vector<8x128xf32>
    %471 = arith.divf %469, %470 : vector<8x128xf32>
    %472 = vector.extract_strided_slice %459 {offsets = [0, 256], sizes = [8, 128], strides = [1, 1]} : vector<8x512xf32> to vector<8x128xf32>
    %473 = math.tanh %472 : vector<8x128xf32>
    %474 = vector.extract_strided_slice %459 {offsets = [0, 384], sizes = [8, 128], strides = [1, 1]} : vector<8x512xf32> to vector<8x128xf32>
    %475 = arith.negf %474 : vector<8x128xf32>
    %476 = math.exp %475 : vector<8x128xf32>
    %cst_99 = arith.constant 1.000000e+00 : f32
    %477 = vector.broadcast %cst_99 : f32 to vector<8x128xf32>
    %478 = arith.addf %477, %476 : vector<8x128xf32>
    %479 = arith.divf %477, %478 : vector<8x128xf32>
    %480 = arith.mulf %471, %427 : vector<8x128xf32>
    %481 = arith.mulf %465, %473 : vector<8x128xf32>
    %482 = arith.addf %480, %481 : vector<8x128xf32>
    %483 = math.tanh %482 : vector<8x128xf32>
    %484 = arith.mulf %479, %483 : vector<8x128xf32>
    %485 = vector.broadcast %c7_i32 : i32 to vector<8x1xi32>
    %486 = arith.cmpi slt, %485, %10 : vector<8x1xi32>
    %487 = vector.shape_cast %486 : vector<8x1xi1> to vector<8x1xi1>
    %488 = vector.broadcast %487 : vector<8x1xi1> to vector<8x128xi1>
    %489 = arith.select %488, %482, %427 : vector<8x128xi1>, vector<8x128xf32>
    %490 = vector.shape_cast %486 : vector<8x1xi1> to vector<8x1xi1>
    %491 = vector.broadcast %490 : vector<8x1xi1> to vector<8x128xi1>
    %492 = arith.select %491, %484, %430 : vector<8x128xi1>, vector<8x128xf32>
    %cst_100 = arith.constant 0.000000e+00 : f32
    %493 = vector.broadcast %cst_100 : f32 to vector<8x128xf32>
    %494 = vector.shape_cast %486 : vector<8x1xi1> to vector<8x1xi1>
    %495 = vector.broadcast %494 : vector<8x1xi1> to vector<8x128xi1>
    %496 = arith.select %495, %484, %493 : vector<8x128xi1>, vector<8x128xf32>
    %497 = vector.broadcast %12 : vector<1x128xf32> to vector<8x128xf32>
    %498 = arith.mulf %496, %497 : vector<8x128xf32>
    %cst_101 = arith.constant dense<0.000000e+00> : vector<8xf32>
    %499 = vector.multi_reduction <add>, %498, %cst_101 [1] : vector<8x128xf32> to vector<8xf32>
    %500 = vector.shape_cast %499 : vector<8xf32> to vector<8x1xf32>
    %501 = arith.addf %500, %11 : vector<8x1xf32>
    %502 = arith.maximumf %440, %501 : vector<8x1xf32>
    %503 = arith.subf %440, %502 : vector<8x1xf32>
    %504 = math.exp %503 : vector<8x1xf32>
    %505 = arith.subf %501, %502 : vector<8x1xf32>
    %506 = math.exp %505 : vector<8x1xf32>
    %507 = arith.mulf %504, %446 : vector<8x1xf32>
    %508 = arith.addf %507, %506 : vector<8x1xf32>
    %509 = vector.broadcast %504 : vector<8x1xf32> to vector<8x128xf32>
    %510 = arith.mulf %509, %451 : vector<8x128xf32>
    %511 = vector.broadcast %506 : vector<8x1xf32> to vector<8x128xf32>
    %512 = arith.mulf %511, %496 : vector<8x128xf32>
    %513 = arith.addf %510, %512 : vector<8x128xf32>
    %c8_i32_102 = arith.constant 8 : i32
    %514 = tpu.reciprocal %508 {approx = true} : vector<8x1xf32> -> vector<8x1xf32>
    %515 = vector.broadcast %514 : vector<8x1xf32> to vector<8x128xf32>
    %516 = arith.mulf %513, %515 : vector<8x128xf32>
    %c0_103 = arith.constant 0 : index
    %c0_104 = arith.constant 0 : index
    %517 = vector.load %arg10[%c0_103, %c0_104] : memref<128x128xf32, #tpu.memory_space<vmem>>, vector<128x128xf32>
    %cst_105 = arith.constant dense<0.000000e+00> : vector<8x128xf32>
    %518 = tpu.matmul %516, %517, %cst_105 {dimension_numbers = #tpu.dot_dimension_numbers<[1], [0], [0], [1], [0, 0, 1, 1], [], []>} : vector<8x128xf32>, vector<128x128xf32>, vector<8x128xf32> -> vector<8x128xf32>
    %c0_106 = arith.constant 0 : index
    %c0_107 = arith.constant 0 : index
    %519 = vector.load %arg11[%c0_106, %c0_107] : memref<1x128xf32, #tpu.memory_space<vmem>>, vector<1x128xf32>
    %520 = vector.broadcast %519 : vector<1x128xf32> to vector<8x128xf32>
    %521 = arith.addf %518, %520 : vector<8x128xf32>
    %c0_108 = arith.constant 0 : index
    %c0_109 = arith.constant 0 : index
    %522 = vector.load %arg12[%c0_108, %c0_109] : memref<8x128xf32, #tpu.memory_space<vmem>>, vector<8x128xf32>
    tpu.vector_store %arg12[%c0_108, %c0_109], %521 {strides = array<i32>} : memref<8x128xf32, #tpu.memory_space<vmem>>, vector<8x128xf32>,
    return
  }
  func.func @transform_0(%arg0: i32) -> (i32, i32) {
    %c0_i32 = arith.constant 0 : i32
    %c0_i32_0 = arith.constant 0 : i32
    return %arg0, %c0_i32 : i32, i32
  }
  func.func @transform_1(%arg0: i32) -> (i32, i32) {
    %c0_i32 = arith.constant 0 : i32
    %c0_i32_0 = arith.constant 0 : i32
    return %arg0, %c0_i32 : i32, i32
  }
  func.func @transform_2(%arg0: i32) -> (i32, i32) {
    %c0_i32 = arith.constant 0 : i32
    %c0_i32_0 = arith.constant 0 : i32
    return %arg0, %c0_i32 : i32, i32
  }
  func.func @transform_3(%arg0: i32) -> (i32, i32) {
    %c0_i32 = arith.constant 0 : i32
    %c0_i32_0 = arith.constant 0 : i32
    return %arg0, %c0_i32 : i32, i32
  }
  func.func @transform_4(%arg0: i32) -> (i32, i32) {
    %c0_i32 = arith.constant 0 : i32
    %c0_i32_0 = arith.constant 0 : i32
    %c0_i32_1 = arith.constant 0 : i32
    return %c0_i32, %c0_i32_0 : i32, i32
  }
  func.func @transform_5(%arg0: i32) -> (i32, i32) {
    %c0_i32 = arith.constant 0 : i32
    %c0_i32_0 = arith.constant 0 : i32
    %c0_i32_1 = arith.constant 0 : i32
    return %c0_i32, %c0_i32_0 : i32, i32
  }
  func.func @transform_6(%arg0: i32) -> (i32, i32) {
    %c0_i32 = arith.constant 0 : i32
    %c0_i32_0 = arith.constant 0 : i32
    %c0_i32_1 = arith.constant 0 : i32
    return %c0_i32, %c0_i32_0 : i32, i32
  }
  func.func @transform_7(%arg0: i32) -> (i32, i32) {
    %c0_i32 = arith.constant 0 : i32
    %c0_i32_0 = arith.constant 0 : i32
    %c0_i32_1 = arith.constant 0 : i32
    return %c0_i32, %c0_i32_0 : i32, i32
  }
  func.func @transform_8(%arg0: i32) -> (i32, i32) {
    %c0_i32 = arith.constant 0 : i32
    %c0_i32_0 = arith.constant 0 : i32
    %c0_i32_1 = arith.constant 0 : i32
    return %c0_i32, %c0_i32_0 : i32, i32
  }
  func.func @transform_9(%arg0: i32) -> (i32, i32) {
    %c0_i32 = arith.constant 0 : i32
    %c0_i32_0 = arith.constant 0 : i32
    %c0_i32_1 = arith.constant 0 : i32
    return %c0_i32, %c0_i32_0 : i32, i32
  }
  func.func @transform_10(%arg0: i32) -> (i32, i32) {
    %c0_i32 = arith.constant 0 : i32
    %c0_i32_0 = arith.constant 0 : i32
    %c0_i32_1 = arith.constant 0 : i32
    return %c0_i32, %c0_i32_0 : i32, i32
  }
  func.func @transform_11(%arg0: i32) -> (i32, i32) {
    %c0_i32 = arith.constant 0 : i32
    %c0_i32_0 = arith.constant 0 : i32
    return %arg0, %c0_i32 : i32, i32
  }
}

</mosaic_0001>

<bundles_post_ra>
// kernel: tpu_custom_call.1
= control target key start
LH: loop header
LB: loop body
LE: loop exit
PB: predicated region body
PF: predicated region fallthrough
CT: control target
= control target key end

     0   :  { %16 = vsyncpa [#allocation4], 0  ;;  %s4385_s0 = inlined_call_operand.vmem [shape: f32[64,32], index: 0, kind: input, shape index: {}]   ;;  %s4386_s1 = inlined_call_operand.vmem [shape: s32[8,1], index: 1, kind: input, shape index: {}]   ;;  %s4387_s2 = inlined_call_operand.hbm [shape: f32[8,32], index: 2, kind: input, shape index: {}]   ;;  %s4388_s3 = inlined_call_operand.vmem [shape: f32[8,1], index: 3, kind: input, shape index: {}]   ;;  %s4389_s4 = inlined_call_operand.vmem [shape: f32[32,512], index: 4, kind: input, shape index: {}]   ;;  %s4390_s5 = inlined_call_operand.hbm [shape: f32[32,512], index: 5, kind: input, shape index: {}]   ;;  %s4391_s6 = inlined_call_operand.vmem [shape: f32[1,512], index: 6, kind: input, shape index: {}]   ;;  %s4392_s7 = inlined_call_operand.hbm [shape: f32[128,512], index: 7, kind: input, shape index: {}]   ;;  %s4393_s8 = inlined_call_operand.vmem [shape: f32[1,128], index: 8, kind: input, shape index: {}]   ;;  %s4394_s9 = inlined_call_operand.hbm [shape: f32[128,128], index: 9, kind: input, shape index: {}]   ;;  %s4395_s10 = inlined_call_operand.vmem [shape: f32[1,128], index: 10, kind: input, shape index: {}]   ;;  %s4396_s11 = inlined_call_operand.hbm [shape: f32[8,128], index: 11, kind: output, shape index: {}]  }
   0x1   :  { %17 = vsyncpa [#allocation7], 0 }
   0x2   :  { %18 = vsyncpa [#allocation10], 0 }
   0x3   :  { %19 = vsyncpa [#allocation5], 0  ;;  %s3531_s17 = smov [#allocation6]   ;;  %s3413_s21 = scalar_lea.hbm %s4390_s5, 2048 }
   0x4   :  { %s43_s18 = sshll.u32 %s3531_s17, 4  ;;  %p3414_p0 = scmp.ne.s32.totalorder %s4390_s5, %s3413_s21  ;;  %s44_s18 = int_to_ptr.vmem [resolvable:$true] %s43_s18 }
   0x5   :  { %p3417_p1 = scmp.lt.u32.totalorder %s3413_s21, %s4390_s5 }
   0x7   :  { %p3419_p2 = pnand %p3417_p1, %p3414_p0 }
   0x9   :  { %3422 = shalt.err (!%p3419_p2)
}
   0xa   :  { %s3423_s26 = scalar_lea.vmem %s44_s18, 2048  ;;  %p3428_p4 = scmp.lt.s32.totalorder %s44_s18, %s44_s18 }
   0xb   :  { %p3424_p3 = scmp.ne.s32.totalorder %s44_s18, %s3423_s26  ;;  %p3429_p5 = scmp.lt.s32.totalorder %s3423_s26, %s3423_s26 }
   0xd   :  { %p3430_p6 = por %p3429_p5, %p3428_p4 }
   0xf   :  { %p3431_p7 = pnand %p3430_p6, %p3424_p3 }
  0x11   :  { %3434 = shalt.err (!%p3431_p7)
}
  0x12   :  { %s3532_s27 = smov 512   ;;  %s3533_s28 = smov 32  }
  0x13   :  { %49 = dma.hbm_to_vmem [thread:$0]  %s4390_s5, 2048, %s44_s18, [#allocation7], %s3532_s27, %s3532_s27, %s3533_s28  }
  0x14   :  { %s3534_s12 = smov [#allocation3]   ;;  %s3535_s14 = smov [#allocation8]  }
  0x15   :  { %s30_s13 = sshll.u32 %s3534_s12, 4  ;;  %s57_s15 = sshll.u32 %s3535_s14, 4  ;;  %s31_s13 = int_to_ptr.vmem [resolvable:$true] %s30_s13  ;;  %s58_s15 = int_to_ptr.vmem [resolvable:$true] %s57_s15 }
  0x16   :  { %s3435_s19 = scalar_lea.hbm %s4387_s2, 128 }
  0x17   :  { %p3436_p8 = scmp.ne.s32.totalorder %s4387_s2, %s3435_s19  ;;  %p3439_p9 = scmp.lt.u32.totalorder %s3435_s19, %s4387_s2 }
  0x19   :  { %p3441_p10 = pnand %p3439_p9, %p3436_p8 }
  0x1b   :  { %3444 = shalt.err (!%p3441_p10)
}
  0x1c   :  { %s3445_s5 = scalar_lea.vmem %s31_s13, 128  ;;  %p3450_p12 = scmp.lt.s32.totalorder %s31_s13, %s31_s13 }
  0x1d   :  { %p3446_p11 = scmp.ne.s32.totalorder %s31_s13, %s3445_s5  ;;  %p3451_p13 = scmp.lt.s32.totalorder %s3445_s5, %s3445_s5 }
  0x1f   :  { %p3452_p0 = por %p3451_p13, %p3450_p12 }
  0x21   :  { %p3453_p1 = pnand %p3452_p0, %p3446_p11 }
  0x23   :  { %3456 = shalt.err (!%p3453_p1)
}
  0x24   :  { %33 = dma.hbm_to_vmem [thread:$0]  %s4387_s2, 128, %s31_s13, [#allocation4]  }
  0x25   :  { %s3457_s29 = scalar_lea.hbm %s4392_s7, 8192 }
  0x26   :  { %p3458_p2 = scmp.ne.s32.totalorder %s4392_s7, %s3457_s29  ;;  %p3461_p3 = scmp.lt.u32.totalorder %s3457_s29, %s4392_s7 }
  0x28   :  { %p3463_p4 = pnand %p3461_p3, %p3458_p2 }
  0x2a   :  { %3466 = shalt.err (!%p3463_p4)
}
  0x2b   :  { %s3467_s17 = scalar_lea.vmem %s58_s15, 8192  ;;  %p3472_p6 = scmp.lt.s32.totalorder %s58_s15, %s58_s15 }
  0x2c   :  { %p3468_p5 = scmp.ne.s32.totalorder %s58_s15, %s3467_s17  ;;  %p3473_p7 = scmp.lt.s32.totalorder %s3467_s17, %s3467_s17 }
  0x2e   :  { %p3474_p8 = por %p3473_p7, %p3472_p6 }
  0x30   :  { %p3475_p9 = pnand %p3474_p8, %p3468_p5 }
  0x32   :  { %3478 = shalt.err (!%p3475_p9)
}
  0x33   :  { %63 = dma.hbm_to_vmem [thread:$0]  %s4392_s7, 8192, %s58_s15, [#allocation7], %s3532_s27, %s3532_s27, %s3533_s28  }
  0x34   :  { %s3536_s19 = smov [#allocation9]   ;;  %s3479_s23 = scalar_lea.hbm %s4394_s9, 2048 }
  0x35   :  { %s71_s20 = sshll.u32 %s3536_s19, 4  ;;  %p3480_p10 = scmp.ne.s32.totalorder %s4394_s9, %s3479_s23  ;;  %s72_s20 = int_to_ptr.vmem [resolvable:$true] %s71_s20 }
  0x36   :  { %p3483_p11 = scmp.lt.u32.totalorder %s3479_s23, %s4394_s9 }
  0x38   :  { %p3485_p12 = pnand %p3483_p11, %p3480_p10 }
  0x3a   :  { %3488 = shalt.err (!%p3485_p12)
}
  0x3b   :  { %s3489_s26 = scalar_lea.vmem %s72_s20, 2048  ;;  %p3494_p0 = scmp.lt.s32.totalorder %s72_s20, %s72_s20 }
  0x3c   :  { %p3490_p13 = scmp.ne.s32.totalorder %s72_s20, %s3489_s26  ;;  %p3495_p1 = scmp.lt.s32.totalorder %s3489_s26, %s3489_s26 }
  0x3e   :  { %p3496_p2 = por %p3495_p1, %p3494_p0 }
  0x40   :  { %p3497_p3 = pnand %p3496_p2, %p3490_p13 }
  0x42   :  { %3500 = shalt.err (!%p3497_p3)
}
  0x43   :  { %s3537_s7 = smov 128   ;;  %s3538_s27 = smov 8  }
  0x44   :  { %77 = dma.hbm_to_vmem [thread:$0]  %s4394_s9, 2048, %s72_s20, [#allocation10], %s3537_s7, %s3537_s7, %s3538_s27  }
  0x45   :  { %3523 = dma.done.wait [#allocation4], 128  }
  0x46   :  { %3524 = vsyncadd [#allocation4], 4294967168 }
  0x47   :  { %3525 = dma.done.wait [#allocation7], 10240  }
  0x48   :  { %3526 = vsyncadd [#allocation7], 4294957056 }
  0x49   :  { %3527 = dma.done.wait [#allocation10], 2048  }
  0x4a   :  { %3528 = vsyncadd [#allocation10], 4294965248  ;;  %v3539_v0 = vmov 0.0   ;;  %v3540_v1 = vmov 0   ;;  %v101_v2 = vld [vmem:[%s4389_s4 + $0x8] sm:$0xff]  ;;  %v103_v4 = vld [vmem:[%s4389_s4 + $0x18] sm:$0xff] }
  0x4b   :  { %205 = vmatprep.mubr.f32.mxu0 %v3539_v0  ;;  %318 = vmatprep.mubr.f32.mxu1 %v3539_v0  ;;  %v105_v3 = vld [vmem:[%s4389_s4 + $0x28] sm:$0xff]  ;;  %v107_v6 = vld [vmem:[%s4389_s4 + $0x38] sm:$0xff]  ;;  %v100_v7 = vld [vmem:[%s4389_s4] sm:$0xff]  ;;  %vm116_vm0 = vcmask 261120   ;;  %s3543_s13 = smov [#allocation11]  }
  0x4c   :  { %3248 = vset.pattern.permute.xlu0 %v3540_v1  ;;  %3249 = vset.pattern.permute.xlu1 %v3540_v1  ;;  %v2603_v5 = vpack.c.bf16 %v105_v3, %v101_v2  ;;  %v104_v8 = vld [vmem:[%s4389_s4 + $0x20] sm:$0xff]  ;;  %v2611_v9 = vpack.c.bf16 %v107_v6, %v103_v4  ;;  %v102_v11 = vld [vmem:[%s4389_s4 + $0x10] sm:$0xff]  ;;  %v109_v13 = vld [vmem:[%s4389_s4 + $0x48] sm:$0xff]  ;;  %s2487_s19 = sshll.u32 %s3543_s13, 4  ;;  %s2488_s19 = int_to_ptr.vmem [resolvable:$true] %s2487_s19 }
  0x4d   :  { %v2605_v10 = vpack.c.bf16 %v104_v8, %v100_v7  ;;  %v106_v12 = vld [vmem:[%s4389_s4 + $0x30] sm:$0xff]  ;;  %v113_v15 = vld [vmem:[%s4389_s4 + $0x68] sm:$0xff]  ;;  %v111_v16 = vld [vmem:[%s4389_s4 + $0x58] sm:$0xff]  ;;  %s3501_s20 = scalar_lea.vmem %s2488_s19, 128  ;;  %p3506_p5 = scmp.lt.s32.totalorder %s2488_s19, %s2488_s19 }
  0x4e   :  { %2604 = vmatprep.subr.bf16.mxu0 %v2603_v5  ;;  %v2613_v14 = vpack.c.bf16 %v106_v12, %v102_v11  ;;  %v115_v17 = vld [vmem:[%s4389_s4 + $0x78] sm:$0xff]  ;;  %2612 = vmatprep.subr.bf16.mxu1 %v2611_v9  ;;  %v2607_v18 = vpack.c.bf16 %v113_v15, %v109_v13  ;;  %v108_v20 = vld [vmem:[%s4389_s4 + $0x40] sm:$0xff]  ;;  %v110_v22 = vld [vmem:[%s4389_s4 + $0x50] sm:$0xff]  ;;  %p3502_p4 = scmp.ne.s32.totalorder %s2488_s19, %s3501_s20  ;;  %p3507_p6 = scmp.lt.s32.totalorder %s3501_s20, %s3501_s20 }
  0x4f   :  { %2606 = vmatpush1.bf16.msra.mxu0 %v2605_v10  ;;  %v2615_v19 = vpack.c.bf16 %v115_v17, %v111_v16  ;;  %v112_v21 = vld [vmem:[%s4389_s4 + $0x60] sm:$0xff]  ;;  %v114_v24 = vld [vmem:[%s4389_s4 + $0x70] sm:$0xff]  ;;  %v400_v32 = vld [vmem:[#allocation6] sm:$0xff] }
  0x50   :  { %2614 = vmatpush1.bf16.msra.mxu1 %v2613_v14  ;;  %v2609_v23 = vpack.c.bf16 %v112_v21, %v108_v20  ;;  %v401_v25 = vld [vmem:[#allocation6 + $0x8] sm:$0xff]  ;;  %2608 = vmatprep.subr.bf16.mxu0 %v2607_v18  ;;  %v2617_v26 = vpack.c.bf16 %v114_v24, %v110_v22  ;;  %v404_v33 = vld [vmem:[#allocation6 + $0x20] sm:$0xff]  ;;  %v92_v35 = vld [vmem:[%s4385_s0] sm:$0xff]  ;;  %p3508_p7 = por %p3507_p6, %p3506_p5 }
  0x51   :  { %2616 = vmatprep.subr.bf16.mxu1 %v2615_v19  ;;  %v405_v27 = vld [vmem:[#allocation6 + $0x28] sm:$0xff]  ;;  %v597_v34 = vld [vmem:[#allocation8] sm:$0xff]  ;;  %v2621_v38 = vpack.c.bf16 %v404_v33, %v400_v32  ;;  %v95_v4 = vld [vmem:[%s4385_s0 + $0x18] sm:$0xff] }
  0x52   :  { %v598_v28 = vld [vmem:[#allocation8 + $0x8] sm:$0xff]  ;;  %v2619_v30 = vpack.c.bf16 %v405_v27, %v401_v25  ;;  %v601_v36 = vld [vmem:[#allocation8 + $0x20] sm:$0xff]  ;;  %v403_v8 = vld [vmem:[#allocation6 + $0x18] sm:$0xff]  ;;  %p3509_p8 = pnand %p3508_p7, %p3502_p4 }
  0x53   :  { %v602_v29 = vld [vmem:[#allocation8 + $0x28] sm:$0xff]  ;;  %2610 = vmatpush1.bf16.msra.mxu0 %v2609_v23  ;;  %v3716_v39 = vpack.c.bf16 %v601_v36, %v597_v34  ;;  %v605_v41 = vld [vmem:[#allocation8 + $0x40] sm:$0xff]  ;;  %v407_v9 = vld [vmem:[#allocation6 + $0x38] sm:$0xff] }
  0x54   :  { %v3710_v31 = vpack.c.bf16 %v602_v29, %v598_v28  ;;  %v606_v37 = vld [vmem:[#allocation8 + $0x48] sm:$0xff]  ;;  %2618 = vmatpush1.bf16.msra.mxu1 %v2617_v26  ;;  %v609_v42 = vld [vmem:[#allocation8 + $0x60] sm:$0xff]  ;;  %v2627_v11 = vpack.c.bf16 %v407_v9, %v403_v8  ;;  %v96_v14 = vld [vmem:[%s4385_s0 + $0x20] sm:$0xff] }
  0x55   :  { %v610_v40 = vld [vmem:[#allocation8 + $0x68] sm:$0xff]  ;;  %2620 = vmatprep.subr.bf16.mxu1 %v2619_v30  ;;  %v93_v46 = vld [vmem:[%s4385_s0 + $0x8] sm:$0xff]  ;;  %v3726_v47 = vpack.c.bf16 %v609_v42, %v605_v41  ;;  %v3802_v34 = vld [vmem:[%s4386_s1] sm:$0xff] }
  0x56   :  { %2636 = vmatprep.subr.bf16.mxu0 %v3710_v31  ;;  %v3718_v43 = vpack.c.bf16 %v610_v40, %v606_v37  ;;  %2505 = vmatmul.mubr.msk.f32.vlgmr.msra.gmra.mrb[0].mxu0 %vm116_vm0, %v92_v35  ;;  %v614_v44 = vld [vmem:[#allocation8 + $0x88] sm:$0xff]  ;;  %v613_v48 = vld [vmem:[#allocation8 + $0x80] sm:$0xff]  ;;  %vm831_vm1 = vcmp.gt.s32.totalorder %v3802_v34, 0  ;;  %vm1051_vm2 = vcmp.gt.s32.totalorder %v3802_v34, 1  ;;  %v406_v40 = vld [vmem:[#allocation6 + $0x30] sm:$0xff]  ;;  %vm1699_vm3 = vcmp.gt.s32.totalorder %v3802_v34, 4 }
  0x57   :  { %v618_v45 = vld [vmem:[#allocation8 + $0xa8] sm:$0xff]  ;;  %2513 = vmatmul.mubr.msk.f32.vlgmr.msra.gmra.mrb[0].mxu1 %vm116_vm0, %v92_v35  ;;  %2638 = vmatpush1.bf16.msra.mxu0 %v3716_v39  ;;  %v617_v49 = vld [vmem:[#allocation8 + $0xa0] sm:$0xff]  ;;  %v99_v35 = vld [vmem:[%s4385_s0 + $0x38] sm:$0xff]  ;;  %v832_v37 = vsel %vm831_vm1, 1, %v3540_v1  ;;  %vm2131_vm4 = vcmp.gt.s32.totalorder %v3802_v34, 6  ;;  %vm1267_vm6 = vcmp.gt.s32.totalorder %v3802_v34, 2 }
  0x58   :  { %2622 = vmatpush1.bf16.msra.mxu1 %v2621_v38  ;;  %211 = vmatprep.mubr.f32.mxu0 %v3539_v0  ;;  %v409_v50 = vld [vmem:[#allocation6 + $0x48] sm:$0xff]  ;;  %v3731_v51 = vpack.c.bf16 %v618_v45, %v614_v44  ;;  %v408_v56 = vld [vmem:[#allocation6 + $0x40] sm:$0xff]  ;;  %v3739_v59 = vpack.c.bf16 %v617_v49, %v613_v48  ;;  %v402_v38 = vld [vmem:[#allocation6 + $0x10] sm:$0xff]  ;;  %v1052_v44 = vsel %vm1051_vm2, 1, %v3540_v1  ;;  %vm1483_vm7 = vcmp.gt.s32.totalorder %v3802_v34, 3 }
  0x59   :  { %324 = vmatprep.mubr.f32.mxu1 %v3539_v0  ;;  %2640 = vmatprep.subr.bf16.mxu0 %v3718_v43  ;;  %v622_v52 = vld [vmem:[#allocation8 + $0xc8] sm:$0xff]  ;;  %v412_v57 = vld [vmem:[#allocation6 + $0x60] sm:$0xff]  ;;  %v411_v41 = vld [vmem:[#allocation6 + $0x58] sm:$0xff]  ;;  %vm1915_vm8 = vcmp.gt.s32.totalorder %v3802_v34, 5  ;;  %vm2347_vm9 = vcmp.gt.s32.totalorder %v3802_v34, 7  ;;  %vm3542_vm1 = vmmov 0  }
  0x5a   :  { %v413_v53 = vld [vmem:[#allocation6 + $0x68] sm:$0xff]  ;;  %2506 = vmatmul.mubr.msk.f32.gmra.mrb[2].mxu0 %vm116_vm0, %v93_v46  ;;  %v2625_v60 = vpack.c.bf16 %v412_v57, %v408_v56  ;;  %v621_v61 = vld [vmem:[#allocation8 + $0xc0] sm:$0xff]  ;;  %834 = vperm.xlu0 %3248, %v832_v37   ;;  %v415_v42 = vld [vmem:[#allocation6 + $0x78] sm:$0xff] }
  0x5b   :  { %v626_v54 = vld [vmem:[#allocation8 + $0xe8] sm:$0xff]  ;;  %v2623_v55 = vpack.c.bf16 %v413_v53, %v409_v50  ;;  %2514 = vmatmul.mubr.msk.f32.gmra.mrb[2].mxu1 %vm116_vm0, %v93_v46  ;;  %2642 = vmatpush1.bf16.msra.mxu0 %v3726_v47  ;;  %v625_v62 = vld [vmem:[#allocation8 + $0xe0] sm:$0xff]  ;;  %v399_v45 = vld [vmem:[#allocation3] sm:$0xff]  ;;  %v2629_v46 = vpack.c.bf16 %v406_v40, %v402_v38  ;;  %v2631_v48 = vpack.c.bf16 %v415_v42, %v411_v41 }
  0x5c   :  { %v94_v58 = vld [vmem:[%s4385_s0 + $0x10] sm:$0xff]  ;;  %217 = vmatprep.mubr.f32.mxu0 %v3539_v0  ;;  %330 = vmatprep.mubr.f32.mxu1 %v3539_v0  ;;  %v3744_v63 = vpack.c.bf16 %v626_v54, %v622_v52  ;;  %v3752_v5 = vpack.c.bf16 %v625_v62, %v621_v61  ;;  %v629_v6 = vld [vmem:[#allocation8 + $0x100] sm:$0xff]  ;;  %v410_v49 = vld [vmem:[#allocation6 + $0x50] sm:$0xff]  ;;  %v1700_v54 = vsel %vm1699_vm3, 1, %v3540_v1  ;;  %v2132_v62 = vsel %vm2131_vm4, 1, %v3540_v1 }
  0x5d   :  { %2644 = vmatprep.subr.bf16.mxu0 %v3731_v51  ;;  %2624 = vmatprep.subr.bf16.mxu1 %v2623_v55  ;;  %v630_v2 = vld [vmem:[#allocation8 + $0x108] sm:$0xff]  ;;  %v633_v7 = vld [vmem:[#allocation8 + $0x120] sm:$0xff]  ;;  %v414_v50 = vld [vmem:[#allocation6 + $0x70] sm:$0xff] }
  0x5e   :  { %2507 = vmatmul.mubr.msk.f32.gmra.mrb[4].mxu0 %vm116_vm0, %v94_v58  ;;  %v634_v3 = vld [vmem:[#allocation8 + $0x128] sm:$0xff]  ;;  %2626 = vmatpush1.bf16.msra.mxu1 %v2625_v60  ;;  %v3765_v15 = vpack.c.bf16 %v633_v7, %v629_v6  ;;  %v637_v16 = vld [vmem:[#allocation8 + $0x140] sm:$0xff]  ;;  %v600_v52 = vld [vmem:[#allocation8 + $0x18] sm:$0xff]  ;;  %v2633_v55 = vpack.c.bf16 %v414_v50, %v410_v49 }
  0x5f   :  { %2515 = vmatmul.mubr.msk.f32.gmra.mrb[4].mxu1 %vm116_vm0, %v94_v58  ;;  %2646 = vmatpush1.bf16.msra.mxu0 %v3739_v59  ;;  %v3757_v10 = vpack.c.bf16 %v634_v3, %v630_v2  ;;  %v638_v12 = vld [vmem:[#allocation8 + $0x148] sm:$0xff]  ;;  %v641_v17 = vld [vmem:[#allocation8 + $0x160] sm:$0xff]  ;;  %v604_v53 = vld [vmem:[#allocation8 + $0x38] sm:$0xff] }
  0x60   :  { %223 = vmatprep.mubr.f32.mxu0 %v3539_v0  ;;  %336 = vmatprep.mubr.f32.mxu1 %v3539_v0  ;;  %v642_v13 = vld [vmem:[#allocation8 + $0x168] sm:$0xff]  ;;  %v97_v21 = vld [vmem:[%s4385_s0 + $0x28] sm:$0xff]  ;;  %v3778_v22 = vpack.c.bf16 %v641_v17, %v637_v16  ;;  %v3831_v56 = vpack.c.bf16 %v604_v53, %v600_v52  ;;  %v599_v57 = vld [vmem:[#allocation8 + $0x10] sm:$0xff] }
  0x61   :  { %2648 = vmatprep.subr.bf16.mxu0 %v3744_v63  ;;  %v3770_v18 = vpack.c.bf16 %v642_v13, %v638_v12  ;;  %2628 = vmatprep.subr.bf16.mxu1 %v2627_v11  ;;  %v646_v19 = vld [vmem:[#allocation8 + $0x188] sm:$0xff]  ;;  %v645_v23 = vld [vmem:[#allocation8 + $0x180] sm:$0xff]  ;;  %v603_v58 = vld [vmem:[#allocation8 + $0x30] sm:$0xff] }
  0x62   :  { %2508 = vmatmul.mubr.msk.f32.gmra.mrb[6].mxu0 %vm116_vm0, %v95_v4  ;;  %v650_v20 = vld [vmem:[#allocation8 + $0x1a8] sm:$0xff]  ;;  %v649_v24 = vld [vmem:[#allocation8 + $0x1a0] sm:$0xff]  ;;  %1054 = vperm.xlu0 %3248, %v1052_v44   ;;  %v608_v60 = vld [vmem:[#allocation8 + $0x58] sm:$0xff]  ;;  %v3837_v2 = vpack.c.bf16 %v603_v58, %v599_v57 }
  0x63   :  { %2516 = vmatmul.mubr.msk.f32.gmra.mrb[6].mxu1 %vm116_vm0, %v95_v4  ;;  %2650 = vmatpush1.bf16.msra.mxu0 %v3752_v5  ;;  %v3783_v25 = vpack.c.bf16 %v650_v20, %v646_v19  ;;  %v654_v26 = vld [vmem:[#allocation8 + $0x1c8] sm:$0xff]  ;;  %v3791_v29 = vpack.c.bf16 %v649_v24, %v645_v23  ;;  %v653_v30 = vld [vmem:[#allocation8 + $0x1c0] sm:$0xff]  ;;  %v612_v61 = vld [vmem:[#allocation8 + $0x78] sm:$0xff] }
  0x64   :  { %229 = vmatprep.mubr.f32.mxu0 %v3539_v0  ;;  %342 = vmatprep.mubr.f32.mxu1 %v3539_v0  ;;  %v658_v27 = vld [vmem:[#allocation8 + $0x1e8] sm:$0xff]  ;;  %v657_v32 = vld [vmem:[#allocation8 + $0x1e0] sm:$0xff]  ;;  %v3841_v3 = vpack.c.bf16 %v612_v61, %v608_v60  ;;  %v607_v4 = vld [vmem:[#allocation8 + $0x50] sm:$0xff]  ;;  %v418_v60 = vlaneseq }
  0x65   :  { %2652 = vmatprep.subr.bf16.mxu0 %v3757_v10  ;;  %v98_v28 = vld [vmem:[%s4385_s0 + $0x30] sm:$0xff]  ;;  %v3796_v33 = vpack.c.bf16 %v658_v27, %v654_v26  ;;  %v3809_v36 = vpack.c.bf16 %v657_v32, %v653_v30  ;;  %v611_v6 = vld [vmem:[#allocation8 + $0x70] sm:$0xff]  ;;  %v616_v7 = vld [vmem:[#allocation8 + $0x98] sm:$0xff] }
  0x66   :  { %2509 = vmatmul.mubr.msk.f32.gmra.mrb[8].mxu0 %vm116_vm0, %v96_v14  ;;  %1702 = vperm.xlu0 %3248, %v1700_v54   ;;  %v620_v8 = vld [vmem:[#allocation8 + $0xb8] sm:$0xff]  ;;  %v3846_v9 = vpack.c.bf16 %v611_v6, %v607_v4  ;;  %v615_v12 = vld [vmem:[#allocation8 + $0x90] sm:$0xff] }
  0x67   :  { %2517 = vmatmul.mubr.msk.f32.gmra.mrb[8].mxu1 %vm116_vm0, %v96_v14  ;;  %2654 = vmatpush1.bf16.msra.mxu0 %v3765_v15  ;;  %v3850_v11 = vpack.c.bf16 %v620_v8, %v616_v7  ;;  %v619_v13 = vld [vmem:[#allocation8 + $0xb0] sm:$0xff]  ;;  %v624_v14 = vld [vmem:[#allocation8 + $0xd8] sm:$0xff] }
  0x68   :  { %235 = vmatprep.mubr.f32.mxu0 %v3539_v0  ;;  %348 = vmatprep.mubr.f32.mxu1 %v3539_v0  ;;  %v628_v16 = vld [vmem:[#allocation8 + $0xf8] sm:$0xff]  ;;  %v3855_v17 = vpack.c.bf16 %v619_v13, %v615_v12  ;;  %v623_v20 = vld [vmem:[#allocation8 + $0xd0] sm:$0xff] }
  0x69   :  { %2656 = vmatprep.subr.bf16.mxu0 %v3770_v18  ;;  %v3859_v19 = vpack.c.bf16 %v628_v16, %v624_v14  ;;  %v632_v23 = vld [vmem:[#allocation8 + $0x118] sm:$0xff]  ;;  %v635_v30 = vld [vmem:[#allocation8 + $0x130] sm:$0xff] }
  0x6a   :  { %2510 = vmatmul.mubr.msk.f32.gmra.mrb[10].mxu0 %vm116_vm0, %v97_v21  ;;  %2134 = vperm.xlu0 %3248, %v2132_v62   ;;  %v636_v24 = vld [vmem:[#allocation8 + $0x138] sm:$0xff]  ;;  %v639_v40 = vld [vmem:[#allocation8 + $0x150] sm:$0xff]  ;;  %v419_v62 = vshrl.u32 %v418_v60, 7 }
  0x6b   :  { %2518 = vmatmul.mubr.msk.f32.gmra.mrb[10].mxu1 %vm116_vm0, %v97_v21  ;;  %2658 = vmatpush1.bf16.msra.mxu0 %v3778_v22  ;;  %v627_v21 = vld [vmem:[#allocation8 + $0xf0] sm:$0xff]  ;;  %v3867_v27 = vpack.c.bf16 %v636_v24, %v632_v23  ;;  %v640_v32 = vld [vmem:[#allocation8 + $0x158] sm:$0xff] }
  0x6c   :  { %241 = vmatprep.mubr.f32.mxu0 %v3539_v0  ;;  %354 = vmatprep.mubr.f32.mxu1 %v3539_v0  ;;  %v3863_v26 = vpack.c.bf16 %v627_v21, %v623_v20  ;;  %v643_v41 = vld [vmem:[#allocation8 + $0x170] sm:$0xff]  ;;  %v648_v42 = vld [vmem:[#allocation8 + $0x198] sm:$0xff]  ;;  %v424_v8 = vsub.s32 1, %v419_v62  ;;  %v420_v13 = vsub.s32 0, %v419_v62 }
  0x6d   :  { %2660 = vmatprep.subr.bf16.mxu0 %v3783_v25  ;;  %v652_v44 = vld [vmem:[#allocation8 + $0x1b8] sm:$0xff]  ;;  %v651_v49 = vld [vmem:[#allocation8 + $0x1b0] sm:$0xff] }
  0x6e   :  { %2511 = vmatmul.mubr.msk.f32.gmra.mrb[12].mxu0 %vm116_vm0, %v98_v28  ;;  %v656_v50 = vld [vmem:[#allocation8 + $0x1d8] sm:$0xff]  ;;  %v659_v57 = vld [vmem:[#allocation8 + $0x1f0] sm:$0xff] }
  0x6f   :  { %2519 = vmatmul.mubr.msk.f32.gmra.mrb[12].mxu1 %vm116_vm0, %v98_v28  ;;  %2662 = vmatpush1.bf16.msra.mxu0 %v3791_v29  ;;  %v631_v28 = vld [vmem:[#allocation8 + $0x110] sm:$0xff]  ;;  %v660_v52 = vld [vmem:[#allocation8 + $0x1f8] sm:$0xff] }
  0x70   :  { %247 = vmatprep.mubr.f32.mxu0 %v3539_v0  ;;  %360 = vmatprep.mubr.f32.mxu1 %v3539_v0  ;;  %v3871_v37 = vpack.c.bf16 %v635_v30, %v631_v28  ;;  %v3891_v54 = vpack.c.bf16 %v660_v52, %v656_v50  ;;  %v416_v12 = vld [vmem:[%s4391_s6] sm:$0xf] }
  0x71   :  { %2664 = vmatprep.subr.bf16.mxu0 %v3796_v33  ;;  %v425_v14 = vrot.slane %v416_v12, %v424_v8  ;;  %v421_v20 = vrot.slane %v416_v12, %v420_v13 }
  0x72   :  { %2512 = vmatmul.mubr.msk.f32.gmra.mrb[14].mxu0 %vm116_vm0, %v99_v35 }
  0x73   :  { %2520 = vmatmul.mubr.msk.f32.gmra.mrb[14].mxu1 %vm116_vm0, %v99_v35  ;;  %2666 = vmatpush1.bf16.msra.mxu0 %v3809_v36  ;;  %v644_v35 = vld [vmem:[#allocation8 + $0x178] sm:$0xff] }
  0x74   :  { %505 = vmatprep.mubr.f32.mxu1 %v3539_v0  ;;  %725 = vmatprep.mubr.f32.mxu0 %v3539_v0  ;;  %v3875_v38 = vpack.c.bf16 %v644_v35, %v640_v32 }
  0x75   :  { %2700 = vmatprep.subr.bf16.mxu0 %v3710_v31 }
  0x76   :  { %726 = vmatmul.mubr.f32.vlgmr.msra.gmra.mrb[0].mxu0 %v3539_v0 }
  0x77   :  { %2521 = vmatmul.mubr.msk.f32.vlgmr.msra.gmra.mrb[16].mxu1 %vm116_vm0, %v399_v45  ;;  %2702 = vmatpush1.bf16.msra.mxu0 %v3716_v39 }
  0x78   :  { %2630 = vmatpush1.bf16.msra.mxu1 %v2629_v46  ;;  %576 = vmatprep.mubr.f32.mxu1 %v3539_v0  ;;  %v3883_v46 = vpack.c.bf16 %v652_v44, %v648_v42 }
  0x79   :  { %2632 = vmatprep.subr.bf16.mxu1 %v2631_v48  ;;  %2704 = vmatprep.subr.bf16.mxu0 %v3718_v43  ;;  %v647_v48 = vld [vmem:[#allocation8 + $0x190] sm:$0xff] }
  0x7a   :  { %945 = vmatprep.mubr.f32.mxu0 %v3539_v0  ;;  %v3887_v53 = vpack.c.bf16 %v651_v49, %v647_v48 }
  0x7b   :  { %2706 = vmatpush1.bf16.msra.mxu0 %v3726_v47 }
  0x7c   :  { %2634 = vmatpush1.bf16.msra.mxu1 %v2633_v55  ;;  %2708 = vmatprep.subr.bf16.mxu0 %v3731_v51  ;;  %v655_v55 = vld [vmem:[#allocation8 + $0x1d0] sm:$0xff] }
  0x7d   :  { %2668 = vmatprep.subr.bf16.mxu1 %v3831_v56  ;;  %v3894_v58 = vpack.c.bf16 %v659_v57, %v655_v55 }
  0x7f   :  { %2522 = vmatmul.mubr.msk.f32.vlgmr.msra.gmra.mrb[18].mxu1 %vm116_vm0, %v399_v45  ;;  %2710 = vmatpush1.bf16.msra.mxu0 %v3739_v59  ;;  %v3879_v45 = vpack.c.bf16 %v643_v41, %v639_v40  ;;  %v428_v40 = vsub.s32 2, %v419_v62  ;;  %v432_v41 = vsub.s32 3, %v419_v62 }
  0x80   :  { %2670 = vmatpush1.bf16.msra.mxu1 %v3837_v2  ;;  %796 = vmatprep.mubr.f32.mxu1 %v3539_v0 }
  0x81   :  { %2672 = vmatprep.subr.bf16.mxu1 %v3841_v3  ;;  %2712 = vmatprep.subr.bf16.mxu0 %v3744_v63  ;;  %v429_v48 = vrot.slane %v416_v12, %v428_v40  ;;  %v433_v49 = vrot.slane %v416_v12, %v432_v41  ;;  %v3937_v41 = vld [vmem:[%s4393_s8] ss:$0 sm:$0xff] }
  0x83   :  { %2714 = vmatpush1.bf16.msra.mxu0 %v3752_v5 }
  0x84   :  { %2674 = vmatpush1.bf16.msra.mxu1 %v3846_v9  ;;  %2716 = vmatprep.subr.bf16.mxu0 %v3757_v10 }
  0x85   :  { %2676 = vmatprep.subr.bf16.mxu1 %v3850_v11 }
  0x87   :  { %2718 = vmatpush1.bf16.msra.mxu0 %v3765_v15 }
  0x88   :  { %2678 = vmatpush1.bf16.msra.mxu1 %v3855_v17  ;;  %2720 = vmatprep.subr.bf16.mxu0 %v3770_v18 }
  0x89   :  { %2680 = vmatprep.subr.bf16.mxu1 %v3859_v19 }
  0x8b   :  { %2722 = vmatpush1.bf16.msra.mxu0 %v3778_v22 }
  0x8c   :  { %2682 = vmatpush1.bf16.msra.mxu1 %v3863_v26  ;;  %2724 = vmatprep.subr.bf16.mxu0 %v3783_v25 }
  0x8d   :  { %2684 = vmatprep.subr.bf16.mxu1 %v3867_v27 }
  0x8f   :  { %2726 = vmatpush1.bf16.msra.mxu0 %v3791_v29 }
  0x90   :  { %2686 = vmatpush1.bf16.msra.mxu1 %v3871_v37  ;;  %2728 = vmatprep.subr.bf16.mxu0 %v3796_v33 }
  0x91   :  { %2688 = vmatprep.subr.bf16.mxu1 %v3875_v38 }
  0x93   :  { %2730 = vmatpush1.bf16.msra.mxu0 %v3809_v36 }
  0x94   :  { %2690 = vmatpush1.bf16.msra.mxu1 %v3879_v45  ;;  %2764 = vmatprep.subr.bf16.mxu0 %v3710_v31 }
  0x95   :  { %2692 = vmatprep.subr.bf16.mxu1 %v3883_v46 }
  0x98   :  { %2694 = vmatpush1.bf16.msra.mxu1 %v3887_v53 }
  0x99   :  { %2696 = vmatprep.subr.bf16.mxu1 %v3891_v54 }
  0x9c   :  { %2698 = vmatpush1.bf16.msra.mxu1 %v3894_v58 }
  0x9d   :  { %2732 = vmatprep.subr.bf16.mxu1 %v3831_v56 }
  0x9f   :  { %797 = vmatmul.mubr.f32.vlgmr.msra.gmra.mrb[0].mxu1 %v3539_v0 }
  0xa0   :  { %2734 = vmatpush1.bf16.msra.mxu1 %v3837_v2  ;;  %1016 = vmatprep.mubr.f32.mxu1 %v3539_v0 }
  0xa1   :  { %2736 = vmatprep.subr.bf16.mxu1 %v3841_v3 }
  0xa4   :  { %2738 = vmatpush1.bf16.msra.mxu1 %v3846_v9 }
  0xa5   :  { %2740 = vmatprep.subr.bf16.mxu1 %v3850_v11 }
  0xa8   :  { %2742 = vmatpush1.bf16.msra.mxu1 %v3855_v17 }
  0xa9   :  { %2744 = vmatprep.subr.bf16.mxu1 %v3859_v19 }
  0xac   :  { %2746 = vmatpush1.bf16.msra.mxu1 %v3863_v26 }
  0xad   :  { %2748 = vmatprep.subr.bf16.mxu1 %v3867_v27 }
  0xb0   :  { %2750 = vmatpush1.bf16.msra.mxu1 %v3871_v37 }
  0xb1   :  { %2752 = vmatprep.subr.bf16.mxu1 %v3875_v38 }
  0xb4   :  { %2754 = vmatpush1.bf16.msra.mxu1 %v3879_v45 }
  0xb5   :  { %2756 = vmatprep.subr.bf16.mxu1 %v3883_v46 }
  0xb8   :  { %2758 = vmatpush1.bf16.msra.mxu1 %v3887_v53 }
  0xb9   :  { %2760 = vmatprep.subr.bf16.mxu1 %v3891_v54 }
  0xbc   :  { %2762 = vmatpush1.bf16.msra.mxu1 %v3894_v58 }
  0xbd   :  { %2796 = vmatprep.subr.bf16.mxu1 %v3831_v56 }
  0xd9   :  { %v835_v12 = vpop.permute.xlu0 %834 }
  0xda   :  { %vm836_vm5 = vcmp.eq.s32.totalorder %v835_v12, 1 }
 0x149   :  { %v727_v61 = vpop.f32.mrb[0].mxu0 }
 0x14a   :  { %v507_v4 = vpop.f32.mrb[16].mxu1  ;;  %v729_v6 = vpop.f32.mrb[1].mxu0 }
 0x14b   :  { %v509_v7 = vpop.f32.mrb[17].mxu1  ;;  %v3922_v24 = vadd.f32 %v507_v4, %v421_v20 }
 0x14c   :  { %v3920_v23 = vadd.f32 %v509_v7, %v425_v14 }
 0x14d   :  { %v3171_v30 = vadd.f32 %v727_v61, %v3922_v24 }
 0x14e   :  { %v3172_v28 = vadd.f32 %v729_v6, %v3920_v23 }
 0x14f   :  { %v2523_v35 = vmul.f32 -1.442695, %v3171_v30 }
 0x150   :  { %v2524_v32 = vmul.f32 -1.442695, %v3172_v28 }
 0x152   :  { %v578_v16 = vpop.f32.mrb[18].mxu1  ;;  %3250 = vpow2.f32 %v2524_v32 }
 0x153   :  { %v580_v21 = vpop.f32.mrb[19].mxu1  ;;  %3252 = vpow2.f32 %v2523_v35  ;;  %v3926_v55 = vadd.f32 %v578_v16, %v429_v48  ;;  %v1268_v48 = vsel %vm1267_vm6, 1, %v3540_v1 }
 0x154   :  { %v3928_v57 = vadd.f32 %v580_v21, %v433_v49  ;;  %1270 = vperm.xlu1 %3249, %v1268_v48   ;;  %v1484_v49 = vsel %vm1483_vm7, 1, %v3540_v1 }
 0x158   :  { %1486 = vperm.xlu1 %3249, %v1484_v49  }
 0x15c   :  { %v3251_v42 = vpop.eup %3250 }
 0x15d   :  { %v3253_v44 = vpop.eup %3252  ;;  %v816_v50 = vadd.f32 1.0, %v3251_v42 }
 0x15e   :  { %v810_v52 = vadd.f32 1.0, %v3253_v44 }
 0x15f   :  { %3254 = vrcp.f32 %v816_v50  ;;  %v1916_v50 = vsel %vm1915_vm8, 1, %v3540_v1 }
 0x160   :  { %3256 = vrcp.f32 %v810_v52  ;;  %1918 = vperm.xlu1 %3249, %v1916_v50   ;;  %v2348_v52 = vsel %vm2347_vm9, 1, %v3540_v1  ;;  %v1055_v50 = vpop.permute.xlu0 %1054 }
 0x161   :  { %vm1056_vm10 = vcmp.eq.s32.totalorder %v1055_v50, 1 }
 0x164   :  { %2350 = vperm.xlu1 %3249, %v2348_v52  }
 0x169   :  { %v3255_v7 = vpop.eup %3254 }
 0x16a   :  { %v3257_v8 = vpop.eup %3256  ;;  %v826_v14 = vmul.f32 0.0, %v3255_v7 }
 0x172   :  { %v798_v60 = vpop.f32.mrb[0].mxu1 }
 0x173   :  { %v3187_v61 = vadd.f32 %v798_v60, %v3926_v55  ;;  %v800_v4 = vpop.f32.mrb[1].mxu1 }
 0x174   :  { %v3188_v6 = vadd.f32 %v800_v4, %v3928_v57 }
 0x175   :  { %3258 = vtanh.f32 %v3187_v61 }
 0x176   :  { %v2525_v62 = vmul.f32 -1.442695, %v3188_v6 }
 0x178   :  { %3260 = vpow2.f32 %v2525_v62 }
 0x17f   :  { %v3259_v13 = vpop.eup %3258 }
 0x180   :  { %v827_v16 = vmul.f32 %v3259_v13, %v3257_v8 }
 0x182   :  { %v3261_v20 = vpop.eup %3260  ;;  %v828_v21 = vadd.f32 %v827_v16, %v826_v14 }
 0x183   :  { %v823_v28 = vadd.f32 1.0, %v3261_v20 }
 0x184   :  { %3262 = vtanh.f32 %v828_v21  ;;  %v3932_v30 = vsel %vm836_vm5, %v828_v21, 0.0 }
 0x185   :  { %3264 = vrcp.f32 %v823_v28 }
 0x18e   :  { %v3263_v32 = vpop.eup %3262 }
 0x18f   :  { %v3265_v35 = vpop.eup %3264 }
 0x190   :  { %v830_v40 = vmul.f32 %v3265_v35, %v3263_v32 }
 0x192   :  { %2527 = vmatmul.mubr.msk.f32.vlgmr.msra.gmra.mrb[2].mxu0 %vm836_vm5, %v830_v40  ;;  %2528 = vmatmul.mubr.msk.f32.vlgmr.msra.gmra.mrb[2].mxu1 %vm836_vm5, %v830_v40  ;;  %v3939_v42 = vsel %vm836_vm5, %v830_v40, 0.0 }
 0x193   :  { %v845_v44 = vmul.f32 %v3937_v41, %v3939_v42  ;;  %2766 = vmatpush1.bf16.msra.mxu0 %v3716_v39  ;;  %2798 = vmatpush1.bf16.msra.mxu1 %v3837_v2 }
 0x194   :  { %2768 = vmatprep.subr.bf16.mxu0 %v3718_v43  ;;  %2800 = vmatprep.subr.bf16.mxu1 %v3841_v3 }
 0x195   :  { %846 = vadd.xlane.f32.xlu0 %v845_v44  ;;  %1161 = vmatprep.mubr.f32.mxu0 %v3539_v0 }
 0x196   :  { %1232 = vmatprep.mubr.f32.mxu1 %v3539_v0 }
 0x197   :  { %2770 = vmatpush1.bf16.msra.mxu0 %v3726_v47  ;;  %2802 = vmatpush1.bf16.msra.mxu1 %v3846_v9 }
 0x198   :  { %2772 = vmatprep.subr.bf16.mxu0 %v3731_v51  ;;  %2804 = vmatprep.subr.bf16.mxu1 %v3850_v11 }
 0x19b   :  { %2774 = vmatpush1.bf16.msra.mxu0 %v3739_v59  ;;  %2806 = vmatpush1.bf16.msra.mxu1 %v3855_v17 }
 0x19c   :  { %2776 = vmatprep.subr.bf16.mxu0 %v3744_v63  ;;  %2808 = vmatprep.subr.bf16.mxu1 %v3859_v19 }
 0x19f   :  { %2778 = vmatpush1.bf16.msra.mxu0 %v3752_v5  ;;  %2810 = vmatpush1.bf16.msra.mxu1 %v3863_v26 }
 0x1a0   :  { %2780 = vmatprep.subr.bf16.mxu0 %v3757_v10  ;;  %2812 = vmatprep.subr.bf16.mxu1 %v3867_v27 }
 0x1a3   :  { %2782 = vmatpush1.bf16.msra.mxu0 %v3765_v15  ;;  %2814 = vmatpush1.bf16.msra.mxu1 %v3871_v37 }
 0x1a4   :  { %2784 = vmatprep.subr.bf16.mxu0 %v3770_v18  ;;  %2816 = vmatprep.subr.bf16.mxu1 %v3875_v38 }
 0x1a7   :  { %2786 = vmatpush1.bf16.msra.mxu0 %v3778_v22  ;;  %2818 = vmatpush1.bf16.msra.mxu1 %v3879_v45 }
 0x1a8   :  { %2788 = vmatprep.subr.bf16.mxu0 %v3783_v25  ;;  %2820 = vmatprep.subr.bf16.mxu1 %v3883_v46 }
 0x1ab   :  { %2790 = vmatpush1.bf16.msra.mxu0 %v3791_v29  ;;  %2822 = vmatpush1.bf16.msra.mxu1 %v3887_v53 }
 0x1ac   :  { %2792 = vmatprep.subr.bf16.mxu0 %v3796_v33  ;;  %2824 = vmatprep.subr.bf16.mxu1 %v3891_v54 }
 0x1af   :  { %2794 = vmatpush1.bf16.msra.mxu0 %v3809_v36  ;;  %2826 = vmatpush1.bf16.msra.mxu1 %v3894_v58 }
 0x1b0   :  { %2828 = vmatprep.subr.bf16.mxu0 %v3710_v31  ;;  %2860 = vmatprep.subr.bf16.mxu1 %v3831_v56 }
 0x265   :  { %v947_v60 = vpop.f32.mrb[2].mxu0  ;;  %v1018_v61 = vpop.f32.mrb[2].mxu1 }
 0x266   :  { %v3173_v4 = vadd.f32 %v947_v60, %v3922_v24  ;;  %v949_v6 = vpop.f32.mrb[3].mxu0  ;;  %v1020_v62 = vpop.f32.mrb[3].mxu1  ;;  %v3189_v34 = vadd.f32 %v1018_v61, %v3926_v55 }
 0x267   :  { %v3174_v7 = vadd.f32 %v949_v6, %v3920_v23  ;;  %v3190_v13 = vadd.f32 %v1020_v62, %v3928_v57 }
 0x268   :  { %v2529_v8 = vmul.f32 -1.442695, %v3173_v4 }
 0x269   :  { %v2530_v12 = vmul.f32 -1.442695, %v3174_v7  ;;  %v2531_v14 = vmul.f32 -1.442695, %v3190_v13 }
 0x26a   :  { %3266 = vpow2.f32 %v2529_v8 }
 0x26b   :  { %3268 = vpow2.f32 %v2530_v12 }
 0x26c   :  { %3270 = vpow2.f32 %v2531_v14 }
 0x26d   :  { %3272 = vtanh.f32 %v3189_v34 }
 0x274   :  { %v3267_v16 = vpop.eup %3266 }
 0x275   :  { %v3269_v1 = vpop.eup %3268  ;;  %v1030_v20 = vadd.f32 1.0, %v3267_v16 }
 0x276   :  { %v1036_v21 = vadd.f32 1.0, %v3269_v1  ;;  %v3271_v28 = vpop.eup %3270 }
 0x277   :  { %3274 = vrcp.f32 %v1030_v20  ;;  %v3273_v32 = vpop.eup %3272  ;;  %v1043_v48 = vadd.f32 1.0, %v3271_v28 }
 0x278   :  { %3276 = vrcp.f32 %v1036_v21 }
 0x279   :  { %3278 = vrcp.f32 %v1043_v48 }
 0x281   :  { %v3275_v35 = vpop.eup %3274 }
 0x282   :  { %v3277_v40 = vpop.eup %3276  ;;  %v1047_v44 = vmul.f32 %v3275_v35, %v3273_v32 }
 0x283   :  { %v1046_v49 = vmul.f32 %v3277_v40, %v3932_v30  ;;  %v3279_v61 = vpop.eup %3278 }
 0x285   :  { %v1048_v52 = vadd.f32 %v1047_v44, %v1046_v49 }
 0x287   :  { %3280 = vtanh.f32 %v1048_v52  ;;  %v3991_v60 = vsel %vm1056_vm10, %v1048_v52, %v3932_v30 }
 0x291   :  { %v3281_v4 = vpop.eup %3280 }
 0x292   :  { %v1050_v6 = vmul.f32 %v3281_v4, %v3279_v61 }
 0x294   :  { %v3994_v62 = vsel %vm1056_vm10, %v1050_v6, %v3939_v42  ;;  %v3996_v7 = vsel %vm1056_vm10, %v1050_v6, 0.0 }
 0x295   :  { %1162 = vmatmul.mubr.f32.vlgmr.msra.gmra.mrb[4].mxu0 %v3994_v62  ;;  %1233 = vmatmul.mubr.f32.vlgmr.msra.gmra.mrb[4].mxu1 %v3994_v62  ;;  %v1060_v8 = vmul.f32 %v3937_v41, %v3996_v7 }
 0x296   :  { %2830 = vmatpush1.bf16.msra.mxu0 %v3716_v39  ;;  %2862 = vmatpush1.bf16.msra.mxu1 %v3837_v2 }
 0x297   :  { %1061 = vadd.xlane.f32.xlu1 %v1060_v8  ;;  %2832 = vmatprep.subr.bf16.mxu0 %v3718_v43  ;;  %v1271_v8 = vpop.permute.xlu1 %1270 }
 0x298   :  { %2864 = vmatprep.subr.bf16.mxu1 %v3841_v3  ;;  %1377 = vmatprep.mubr.f32.mxu0 %v3539_v0  ;;  %vm1272_vm11 = vcmp.eq.s32.totalorder %v1271_v8, 1 }
 0x299   :  { %1448 = vmatprep.mubr.f32.mxu1 %v3539_v0 }
 0x29a   :  { %2834 = vmatpush1.bf16.msra.mxu0 %v3726_v47  ;;  %2866 = vmatpush1.bf16.msra.mxu1 %v3846_v9 }
 0x29b   :  { %2836 = vmatprep.subr.bf16.mxu0 %v3731_v51  ;;  %2868 = vmatprep.subr.bf16.mxu1 %v3850_v11 }
 0x29e   :  { %2838 = vmatpush1.bf16.msra.mxu0 %v3739_v59  ;;  %2870 = vmatpush1.bf16.msra.mxu1 %v3855_v17 }
 0x29f   :  { %2840 = vmatprep.subr.bf16.mxu0 %v3744_v63  ;;  %2872 = vmatprep.subr.bf16.mxu1 %v3859_v19 }
 0x2a2   :  { %2842 = vmatpush1.bf16.msra.mxu0 %v3752_v5  ;;  %2874 = vmatpush1.bf16.msra.mxu1 %v3863_v26 }
 0x2a3   :  { %2844 = vmatprep.subr.bf16.mxu0 %v3757_v10  ;;  %2876 = vmatprep.subr.bf16.mxu1 %v3867_v27 }
 0x2a6   :  { %2846 = vmatpush1.bf16.msra.mxu0 %v3765_v15  ;;  %2878 = vmatpush1.bf16.msra.mxu1 %v3871_v37 }
 0x2a7   :  { %2848 = vmatprep.subr.bf16.mxu0 %v3770_v18  ;;  %2880 = vmatprep.subr.bf16.mxu1 %v3875_v38 }
 0x2aa   :  { %2850 = vmatpush1.bf16.msra.mxu0 %v3778_v22  ;;  %2882 = vmatpush1.bf16.msra.mxu1 %v3879_v45 }
 0x2ab   :  { %2852 = vmatprep.subr.bf16.mxu0 %v3783_v25  ;;  %2884 = vmatprep.subr.bf16.mxu1 %v3883_v46 }
 0x2ae   :  { %2854 = vmatpush1.bf16.msra.mxu0 %v3791_v29  ;;  %2886 = vmatpush1.bf16.msra.mxu1 %v3887_v53 }
 0x2af   :  { %2856 = vmatprep.subr.bf16.mxu0 %v3796_v33  ;;  %2888 = vmatprep.subr.bf16.mxu1 %v3891_v54 }
 0x2b2   :  { %2858 = vmatpush1.bf16.msra.mxu0 %v3809_v36  ;;  %2890 = vmatpush1.bf16.msra.mxu1 %v3894_v58 }
 0x2b3   :  { %2892 = vmatprep.subr.bf16.mxu0 %v3710_v31  ;;  %2924 = vmatprep.subr.bf16.mxu1 %v3831_v56 }
 0x368   :  { %v1163_v30 = vpop.f32.mrb[4].mxu0  ;;  %v1234_v12 = vpop.f32.mrb[4].mxu1 }
 0x369   :  { %v3175_v13 = vadd.f32 %v1163_v30, %v3922_v24  ;;  %v1165_v14 = vpop.f32.mrb[5].mxu0  ;;  %v1236_v34 = vpop.f32.mrb[5].mxu1  ;;  %v3191_v32 = vadd.f32 %v1234_v12, %v3926_v55 }
 0x36a   :  { %v3176_v16 = vadd.f32 %v1165_v14, %v3920_v23  ;;  %v3192_v21 = vadd.f32 %v1236_v34, %v3928_v57 }
 0x36b   :  { %v2532_v1 = vmul.f32 -1.442695, %v3175_v13 }
 0x36c   :  { %v2533_v20 = vmul.f32 -1.442695, %v3176_v16  ;;  %v2534_v28 = vmul.f32 -1.442695, %v3192_v21 }
 0x36d   :  { %3282 = vpow2.f32 %v2532_v1 }
 0x36e   :  { %3284 = vpow2.f32 %v2533_v20 }
 0x36f   :  { %3286 = vpow2.f32 %v2534_v28 }
 0x370   :  { %3288 = vtanh.f32 %v3191_v32 }
 0x377   :  { %v3283_v35 = vpop.eup %3282 }
 0x378   :  { %v3285_v40 = vpop.eup %3284  ;;  %v1246_v44 = vadd.f32 1.0, %v3283_v35 }
 0x379   :  { %v1252_v48 = vadd.f32 1.0, %v3285_v40  ;;  %v3287_v49 = vpop.eup %3286 }
 0x37a   :  { %3290 = vrcp.f32 %v1246_v44  ;;  %v3289_v50 = vpop.eup %3288  ;;  %v1259_v6 = vadd.f32 1.0, %v3287_v49 }
 0x37b   :  { %3292 = vrcp.f32 %v1252_v48 }
 0x37c   :  { %3294 = vrcp.f32 %v1259_v6 }
 0x384   :  { %v3291_v52 = vpop.eup %3290 }
 0x385   :  { %v3293_v61 = vpop.eup %3292  ;;  %v1263_v4 = vmul.f32 %v3291_v52, %v3289_v50 }
 0x386   :  { %v1262_v30 = vmul.f32 %v3293_v61, %v3991_v60  ;;  %v3295_v14 = vpop.eup %3294 }
 0x388   :  { %v1264_v13 = vadd.f32 %v1263_v4, %v1262_v30 }
 0x38a   :  { %3296 = vtanh.f32 %v1264_v13  ;;  %v4042_v12 = vsel %vm1272_vm11, %v1264_v13, %v3991_v60 }
 0x394   :  { %v3297_v34 = vpop.eup %3296 }
 0x395   :  { %v1266_v16 = vmul.f32 %v3297_v34, %v3295_v14 }
 0x397   :  { %v4045_v1 = vsel %vm1272_vm11, %v1266_v16, %v3994_v62  ;;  %v4047_v20 = vsel %vm1272_vm11, %v1266_v16, 0.0 }
 0x398   :  { %1378 = vmatmul.mubr.f32.vlgmr.msra.gmra.mrb[6].mxu0 %v4045_v1  ;;  %1449 = vmatmul.mubr.f32.vlgmr.msra.gmra.mrb[6].mxu1 %v4045_v1  ;;  %v1276_v21 = vmul.f32 %v3937_v41, %v4047_v20 }
 0x399   :  { %2894 = vmatpush1.bf16.msra.mxu0 %v3716_v39  ;;  %2926 = vmatpush1.bf16.msra.mxu1 %v3837_v2 }
 0x39a   :  { %1277 = vadd.xlane.f32.xlu0 %v1276_v21  ;;  %2896 = vmatprep.subr.bf16.mxu0 %v3718_v43 }
 0x39b   :  { %2928 = vmatprep.subr.bf16.mxu1 %v3841_v3  ;;  %1593 = vmatprep.mubr.f32.mxu0 %v3539_v0 }
 0x39c   :  { %1664 = vmatprep.mubr.f32.mxu1 %v3539_v0 }
 0x39d   :  { %2898 = vmatpush1.bf16.msra.mxu0 %v3726_v47  ;;  %2930 = vmatpush1.bf16.msra.mxu1 %v3846_v9 }
 0x39e   :  { %2900 = vmatprep.subr.bf16.mxu0 %v3731_v51  ;;  %2932 = vmatprep.subr.bf16.mxu1 %v3850_v11 }
 0x3a1   :  { %2902 = vmatpush1.bf16.msra.mxu0 %v3739_v59  ;;  %2934 = vmatpush1.bf16.msra.mxu1 %v3855_v17 }
 0x3a2   :  { %2904 = vmatprep.subr.bf16.mxu0 %v3744_v63  ;;  %2936 = vmatprep.subr.bf16.mxu1 %v3859_v19 }
 0x3a5   :  { %2906 = vmatpush1.bf16.msra.mxu0 %v3752_v5  ;;  %2938 = vmatpush1.bf16.msra.mxu1 %v3863_v26 }
 0x3a6   :  { %2908 = vmatprep.subr.bf16.mxu0 %v3757_v10  ;;  %2940 = vmatprep.subr.bf16.mxu1 %v3867_v27 }
 0x3a9   :  { %2910 = vmatpush1.bf16.msra.mxu0 %v3765_v15  ;;  %2942 = vmatpush1.bf16.msra.mxu1 %v3871_v37 }
 0x3aa   :  { %2912 = vmatprep.subr.bf16.mxu0 %v3770_v18  ;;  %2944 = vmatprep.subr.bf16.mxu1 %v3875_v38 }
 0x3ad   :  { %2914 = vmatpush1.bf16.msra.mxu0 %v3778_v22  ;;  %2946 = vmatpush1.bf16.msra.mxu1 %v3879_v45 }
 0x3ae   :  { %2916 = vmatprep.subr.bf16.mxu0 %v3783_v25  ;;  %2948 = vmatprep.subr.bf16.mxu1 %v3883_v46 }
 0x3b1   :  { %2918 = vmatpush1.bf16.msra.mxu0 %v3791_v29  ;;  %2950 = vmatpush1.bf16.msra.mxu1 %v3887_v53 }
 0x3b2   :  { %2920 = vmatprep.subr.bf16.mxu0 %v3796_v33  ;;  %2952 = vmatprep.subr.bf16.mxu1 %v3891_v54 }
 0x3b5   :  { %2922 = vmatpush1.bf16.msra.mxu0 %v3809_v36  ;;  %2954 = vmatpush1.bf16.msra.mxu1 %v3894_v58 }
 0x3b6   :  { %2956 = vmatprep.subr.bf16.mxu0 %v3710_v31  ;;  %2988 = vmatprep.subr.bf16.mxu1 %v3831_v56 }
 0x46b   :  { %v1379_v60 = vpop.f32.mrb[6].mxu0  ;;  %v1450_v62 = vpop.f32.mrb[6].mxu1 }
 0x46c   :  { %v3177_v28 = vadd.f32 %v1379_v60, %v3922_v24  ;;  %v1381_v32 = vpop.f32.mrb[7].mxu0  ;;  %v1452_v35 = vpop.f32.mrb[7].mxu1  ;;  %v3193_v52 = vadd.f32 %v1450_v62, %v3926_v55 }
 0x46d   :  { %v3178_v40 = vadd.f32 %v1381_v32, %v3920_v23  ;;  %v3194_v49 = vadd.f32 %v1452_v35, %v3928_v57 }
 0x46e   :  { %v2535_v44 = vmul.f32 -1.442695, %v3177_v28  ;;  %v1487_v28 = vpop.permute.xlu1 %1486 }
 0x46f   :  { %v2536_v48 = vmul.f32 -1.442695, %v3178_v40  ;;  %v2537_v50 = vmul.f32 -1.442695, %v3194_v49  ;;  %vm1488_vm12 = vcmp.eq.s32.totalorder %v1487_v28, 1 }
 0x470   :  { %3298 = vpow2.f32 %v2535_v44 }
 0x471   :  { %3300 = vpow2.f32 %v2536_v48 }
 0x472   :  { %3302 = vpow2.f32 %v2537_v50 }
 0x473   :  { %3304 = vtanh.f32 %v3193_v52 }
 0x47a   :  { %v3299_v61 = vpop.eup %3298 }
 0x47b   :  { %v3301_v4 = vpop.eup %3300  ;;  %v1462_v6 = vadd.f32 1.0, %v3299_v61 }
 0x47c   :  { %v1468_v8 = vadd.f32 1.0, %v3301_v4  ;;  %v3303_v30 = vpop.eup %3302 }
 0x47d   :  { %3306 = vrcp.f32 %v1462_v6  ;;  %v3305_v13 = vpop.eup %3304  ;;  %v1475_v21 = vadd.f32 1.0, %v3303_v30 }
 0x47e   :  { %3308 = vrcp.f32 %v1468_v8 }
 0x47f   :  { %3310 = vrcp.f32 %v1475_v21 }
 0x487   :  { %v3307_v14 = vpop.eup %3306 }
 0x488   :  { %v3309_v34 = vpop.eup %3308  ;;  %v1479_v16 = vmul.f32 %v3307_v14, %v3305_v13 }
 0x489   :  { %v1478_v60 = vmul.f32 %v3309_v34, %v4042_v12  ;;  %v3311_v35 = vpop.eup %3310 }
 0x48b   :  { %v1480_v32 = vadd.f32 %v1479_v16, %v1478_v60 }
 0x48d   :  { %3312 = vtanh.f32 %v1480_v32  ;;  %v4093_v62 = vsel %vm1488_vm12, %v1480_v32, %v4042_v12 }
 0x497   :  { %v3313_v40 = vpop.eup %3312 }
 0x498   :  { %v1482_v44 = vmul.f32 %v3313_v40, %v3311_v35 }
 0x49a   :  { %v4096_v48 = vsel %vm1488_vm12, %v1482_v44, %v4045_v1  ;;  %v4098_v49 = vsel %vm1488_vm12, %v1482_v44, 0.0 }
 0x49b   :  { %1594 = vmatmul.mubr.f32.vlgmr.msra.gmra.mrb[8].mxu0 %v4096_v48  ;;  %1665 = vmatmul.mubr.f32.vlgmr.msra.gmra.mrb[8].mxu1 %v4096_v48  ;;  %v1492_v50 = vmul.f32 %v3937_v41, %v4098_v49 }
 0x49c   :  { %2958 = vmatpush1.bf16.msra.mxu0 %v3716_v39  ;;  %2990 = vmatpush1.bf16.msra.mxu1 %v3837_v2 }
 0x49d   :  { %1493 = vadd.xlane.f32.xlu0 %v1492_v50  ;;  %2960 = vmatprep.subr.bf16.mxu0 %v3718_v43 }
 0x49e   :  { %2992 = vmatprep.subr.bf16.mxu1 %v3841_v3  ;;  %1809 = vmatprep.mubr.f32.mxu0 %v3539_v0 }
 0x49f   :  { %1880 = vmatprep.mubr.f32.mxu1 %v3539_v0 }
 0x4a0   :  { %2962 = vmatpush1.bf16.msra.mxu0 %v3726_v47  ;;  %2994 = vmatpush1.bf16.msra.mxu1 %v3846_v9 }
 0x4a1   :  { %2964 = vmatprep.subr.bf16.mxu0 %v3731_v51  ;;  %2996 = vmatprep.subr.bf16.mxu1 %v3850_v11 }
 0x4a4   :  { %2966 = vmatpush1.bf16.msra.mxu0 %v3739_v59  ;;  %2998 = vmatpush1.bf16.msra.mxu1 %v3855_v17 }
 0x4a5   :  { %2968 = vmatprep.subr.bf16.mxu0 %v3744_v63  ;;  %3000 = vmatprep.subr.bf16.mxu1 %v3859_v19 }
 0x4a8   :  { %2970 = vmatpush1.bf16.msra.mxu0 %v3752_v5  ;;  %3002 = vmatpush1.bf16.msra.mxu1 %v3863_v26 }
 0x4a9   :  { %2972 = vmatprep.subr.bf16.mxu0 %v3757_v10  ;;  %3004 = vmatprep.subr.bf16.mxu1 %v3867_v27 }
 0x4ac   :  { %2974 = vmatpush1.bf16.msra.mxu0 %v3765_v15  ;;  %3006 = vmatpush1.bf16.msra.mxu1 %v3871_v37 }
 0x4ad   :  { %2976 = vmatprep.subr.bf16.mxu0 %v3770_v18  ;;  %3008 = vmatprep.subr.bf16.mxu1 %v3875_v38 }
 0x4b0   :  { %2978 = vmatpush1.bf16.msra.mxu0 %v3778_v22  ;;  %3010 = vmatpush1.bf16.msra.mxu1 %v3879_v45 }
 0x4b1   :  { %2980 = vmatprep.subr.bf16.mxu0 %v3783_v25  ;;  %3012 = vmatprep.subr.bf16.mxu1 %v3883_v46 }
 0x4b4   :  { %2982 = vmatpush1.bf16.msra.mxu0 %v3791_v29  ;;  %3014 = vmatpush1.bf16.msra.mxu1 %v3887_v53 }
 0x4b5   :  { %2984 = vmatprep.subr.bf16.mxu0 %v3796_v33  ;;  %3016 = vmatprep.subr.bf16.mxu1 %v3891_v54 }
 0x4b8   :  { %2986 = vmatpush1.bf16.msra.mxu0 %v3809_v36  ;;  %3018 = vmatpush1.bf16.msra.mxu1 %v3894_v58 }
 0x4b9   :  { %3020 = vmatprep.subr.bf16.mxu0 %v3710_v31  ;;  %3052 = vmatprep.subr.bf16.mxu1 %v3831_v56 }
 0x56e   :  { %v1595_v12 = vpop.f32.mrb[8].mxu0  ;;  %v1666_v1 = vpop.f32.mrb[8].mxu1 }
 0x56f   :  { %v3179_v52 = vadd.f32 %v1595_v12, %v3922_v24  ;;  %v1597_v61 = vpop.f32.mrb[9].mxu0  ;;  %v1668_v4 = vpop.f32.mrb[9].mxu1  ;;  %v3195_v34 = vadd.f32 %v1666_v1, %v3926_v55 }
 0x570   :  { %v3180_v6 = vadd.f32 %v1597_v61, %v3920_v23  ;;  %v3196_v13 = vadd.f32 %v1668_v4, %v3928_v57  ;;  %v1703_v61 = vpop.permute.xlu0 %1702 }
 0x571   :  { %v2538_v8 = vmul.f32 -1.442695, %v3179_v52  ;;  %vm1704_vm13 = vcmp.eq.s32.totalorder %v1703_v61, 1 }
 0x572   :  { %v2539_v30 = vmul.f32 -1.442695, %v3180_v6  ;;  %v2540_v14 = vmul.f32 -1.442695, %v3196_v13 }
 0x573   :  { %3314 = vpow2.f32 %v2538_v8 }
 0x574   :  { %3316 = vpow2.f32 %v2539_v30 }
 0x575   :  { %3318 = vpow2.f32 %v2540_v14 }
 0x576   :  { %3320 = vtanh.f32 %v3195_v34 }
 0x57d   :  { %v3315_v16 = vpop.eup %3314 }
 0x57e   :  { %v3317_v21 = vpop.eup %3316  ;;  %v1678_v60 = vadd.f32 1.0, %v3315_v16 }
 0x57f   :  { %v1684_v28 = vadd.f32 1.0, %v3317_v21  ;;  %v3319_v32 = vpop.eup %3318 }
 0x580   :  { %3322 = vrcp.f32 %v1678_v60  ;;  %v3321_v35 = vpop.eup %3320  ;;  %v1691_v12 = vadd.f32 1.0, %v3319_v32 }
 0x581   :  { %3324 = vrcp.f32 %v1684_v28 }
 0x582   :  { %3326 = vrcp.f32 %v1691_v12 }
 0x58a   :  { %v3323_v40 = vpop.eup %3322 }
 0x58b   :  { %v3325_v44 = vpop.eup %3324  ;;  %v1695_v50 = vmul.f32 %v3323_v40, %v3321_v35 }
 0x58c   :  { %v1694_v52 = vmul.f32 %v3325_v44, %v4093_v62  ;;  %v3327_v6 = vpop.eup %3326 }
 0x58e   :  { %v1696_v4 = vadd.f32 %v1695_v50, %v1694_v52 }
 0x590   :  { %3328 = vtanh.f32 %v1696_v4  ;;  %v4144_v1 = vsel %vm1704_vm13, %v1696_v4, %v4093_v62 }
 0x59a   :  { %v3329_v8 = vpop.eup %3328 }
 0x59b   :  { %v1698_v30 = vmul.f32 %v3329_v8, %v3327_v6 }
 0x59d   :  { %v4147_v13 = vsel %vm1704_vm13, %v1698_v30, %v4096_v48  ;;  %v4149_v14 = vsel %vm1704_vm13, %v1698_v30, 0.0 }
 0x59e   :  { %1810 = vmatmul.mubr.f32.vlgmr.msra.gmra.mrb[10].mxu0 %v4147_v13  ;;  %1881 = vmatmul.mubr.f32.vlgmr.msra.gmra.mrb[10].mxu1 %v4147_v13  ;;  %v1708_v34 = vmul.f32 %v3937_v41, %v4149_v14 }
 0x59f   :  { %3022 = vmatpush1.bf16.msra.mxu0 %v3716_v39  ;;  %3054 = vmatpush1.bf16.msra.mxu1 %v3837_v2 }
 0x5a0   :  { %1709 = vadd.xlane.f32.xlu1 %v1708_v34  ;;  %3024 = vmatprep.subr.bf16.mxu0 %v3718_v43 }
 0x5a1   :  { %3056 = vmatprep.subr.bf16.mxu1 %v3841_v3  ;;  %2025 = vmatprep.mubr.f32.mxu0 %v3539_v0 }
 0x5a2   :  { %2096 = vmatprep.mubr.f32.mxu1 %v3539_v0 }
 0x5a3   :  { %3026 = vmatpush1.bf16.msra.mxu0 %v3726_v47  ;;  %3058 = vmatpush1.bf16.msra.mxu1 %v3846_v9 }
 0x5a4   :  { %3028 = vmatprep.subr.bf16.mxu0 %v3731_v51  ;;  %3060 = vmatprep.subr.bf16.mxu1 %v3850_v11 }
 0x5a7   :  { %3030 = vmatpush1.bf16.msra.mxu0 %v3739_v59  ;;  %3062 = vmatpush1.bf16.msra.mxu1 %v3855_v17 }
 0x5a8   :  { %3032 = vmatprep.subr.bf16.mxu0 %v3744_v63  ;;  %3064 = vmatprep.subr.bf16.mxu1 %v3859_v19 }
 0x5ab   :  { %3034 = vmatpush1.bf16.msra.mxu0 %v3752_v5  ;;  %3066 = vmatpush1.bf16.msra.mxu1 %v3863_v26 }
 0x5ac   :  { %3036 = vmatprep.subr.bf16.mxu0 %v3757_v10  ;;  %3068 = vmatprep.subr.bf16.mxu1 %v3867_v27 }
 0x5af   :  { %3038 = vmatpush1.bf16.msra.mxu0 %v3765_v15  ;;  %3070 = vmatpush1.bf16.msra.mxu1 %v3871_v37 }
 0x5b0   :  { %3040 = vmatprep.subr.bf16.mxu0 %v3770_v18  ;;  %3072 = vmatprep.subr.bf16.mxu1 %v3875_v38 }
 0x5b3   :  { %3042 = vmatpush1.bf16.msra.mxu0 %v3778_v22  ;;  %3074 = vmatpush1.bf16.msra.mxu1 %v3879_v45 }
 0x5b4   :  { %3044 = vmatprep.subr.bf16.mxu0 %v3783_v25  ;;  %3076 = vmatprep.subr.bf16.mxu1 %v3883_v46 }
 0x5b7   :  { %3046 = vmatpush1.bf16.msra.mxu0 %v3791_v29  ;;  %3078 = vmatpush1.bf16.msra.mxu1 %v3887_v53 }
 0x5b8   :  { %3048 = vmatprep.subr.bf16.mxu0 %v3796_v33  ;;  %3080 = vmatprep.subr.bf16.mxu1 %v3891_v54 }
 0x5bb   :  { %3050 = vmatpush1.bf16.msra.mxu0 %v3809_v36  ;;  %3082 = vmatpush1.bf16.msra.mxu1 %v3894_v58 }
 0x5bc   :  { %3084 = vmatprep.subr.bf16.mxu0 %v3710_v31  ;;  %3116 = vmatprep.subr.bf16.mxu1 %v3831_v56 }
 0x671   :  { %v1811_v62 = vpop.f32.mrb[10].mxu0  ;;  %v1882_v48 = vpop.f32.mrb[10].mxu1 }
 0x672   :  { %v3181_v16 = vadd.f32 %v1811_v62, %v3922_v24  ;;  %v1813_v21 = vpop.f32.mrb[11].mxu0  ;;  %v1884_v60 = vpop.f32.mrb[11].mxu1  ;;  %v3197_v50 = vadd.f32 %v1882_v48, %v3926_v55 }
 0x673   :  { %v3182_v28 = vadd.f32 %v1813_v21, %v3920_v23  ;;  %v3198_v40 = vadd.f32 %v1884_v60, %v3928_v57 }
 0x674   :  { %v2541_v32 = vmul.f32 -1.442695, %v3181_v16  ;;  %v1919_v16 = vpop.permute.xlu1 %1918 }
 0x675   :  { %v2542_v35 = vmul.f32 -1.442695, %v3182_v28  ;;  %v2543_v44 = vmul.f32 -1.442695, %v3198_v40  ;;  %vm1920_vm14 = vcmp.eq.s32.totalorder %v1919_v16, 1 }
 0x676   :  { %3330 = vpow2.f32 %v2541_v32 }
 0x677   :  { %3332 = vpow2.f32 %v2542_v35 }
 0x678   :  { %3334 = vpow2.f32 %v2543_v44 }
 0x679   :  { %3336 = vtanh.f32 %v3197_v50 }
 0x680   :  { %v3331_v31 = vpop.eup %3330 }
 0x681   :  { %v3333_v12 = vpop.eup %3332  ;;  %v1894_v56 = vadd.f32 1.0, %v3331_v31 }
 0x682   :  { %v1900_v52 = vadd.f32 1.0, %v3333_v12  ;;  %v3335_v61 = vpop.eup %3334 }
 0x683   :  { %3338 = vrcp.f32 %v1894_v56  ;;  %v3337_v4 = vpop.eup %3336  ;;  %v1907_v34 = vadd.f32 1.0, %v3335_v61 }
 0x684   :  { %3340 = vrcp.f32 %v1900_v52 }
 0x685   :  { %3342 = vrcp.f32 %v1907_v34 }
 0x68d   :  { %v3339_v6 = vpop.eup %3338 }
 0x68e   :  { %v3341_v8 = vpop.eup %3340  ;;  %v1911_v30 = vmul.f32 %v3339_v6, %v3337_v4 }
 0x68f   :  { %v1910_v62 = vmul.f32 %v3341_v8, %v4144_v1  ;;  %v3343_v60 = vpop.eup %3342 }
 0x691   :  { %v1912_v21 = vadd.f32 %v1911_v30, %v1910_v62 }
 0x693   :  { %3344 = vtanh.f32 %v1912_v21  ;;  %v4195_v48 = vsel %vm1920_vm14, %v1912_v21, %v4144_v1 }
 0x69d   :  { %v3345_v28 = vpop.eup %3344 }
 0x69e   :  { %v1914_v32 = vmul.f32 %v3345_v28, %v3343_v60 }
 0x6a0   :  { %v4198_v35 = vsel %vm1920_vm14, %v1914_v32, %v4147_v13  ;;  %v4200_v40 = vsel %vm1920_vm14, %v1914_v32, 0.0 }
 0x6a1   :  { %2026 = vmatmul.mubr.f32.vlgmr.msra.gmra.mrb[12].mxu0 %v4198_v35  ;;  %2097 = vmatmul.mubr.f32.vlgmr.msra.gmra.mrb[12].mxu1 %v4198_v35  ;;  %v1924_v44 = vmul.f32 %v3937_v41, %v4200_v40 }
 0x6a2   :  { %3086 = vmatpush1.bf16.msra.mxu0 %v3716_v39  ;;  %3118 = vmatpush1.bf16.msra.mxu1 %v3837_v2 }
 0x6a3   :  { %1925 = vadd.xlane.f32.xlu0 %v1924_v44  ;;  %3088 = vmatprep.subr.bf16.mxu0 %v3718_v43 }
 0x6a4   :  { %3120 = vmatprep.subr.bf16.mxu1 %v3841_v3  ;;  %2241 = vmatprep.mubr.f32.mxu0 %v3539_v0 }
 0x6a5   :  { %2312 = vmatprep.mubr.f32.mxu1 %v3539_v0 }
 0x6a6   :  { %3090 = vmatpush1.bf16.msra.mxu0 %v3726_v47  ;;  %3122 = vmatpush1.bf16.msra.mxu1 %v3846_v9 }
 0x6a7   :  { %3092 = vmatprep.subr.bf16.mxu0 %v3731_v51  ;;  %3124 = vmatprep.subr.bf16.mxu1 %v3850_v11 }
 0x6aa   :  { %3094 = vmatpush1.bf16.msra.mxu0 %v3739_v59  ;;  %3126 = vmatpush1.bf16.msra.mxu1 %v3855_v17 }
 0x6ab   :  { %3096 = vmatprep.subr.bf16.mxu0 %v3744_v63  ;;  %3128 = vmatprep.subr.bf16.mxu1 %v3859_v19 }
 0x6ae   :  { %3098 = vmatpush1.bf16.msra.mxu0 %v3752_v5  ;;  %3130 = vmatpush1.bf16.msra.mxu1 %v3863_v26  ;;  %v2135_v26 = vpop.permute.xlu0 %2134 }
 0x6af   :  { %3100 = vmatprep.subr.bf16.mxu0 %v3757_v10  ;;  %3132 = vmatprep.subr.bf16.mxu1 %v3867_v27  ;;  %vm2136_vm15 = vcmp.eq.s32.totalorder %v2135_v26, 1 }
 0x6b2   :  { %3102 = vmatpush1.bf16.msra.mxu0 %v3765_v15  ;;  %3134 = vmatpush1.bf16.msra.mxu1 %v3871_v37 }
 0x6b3   :  { %3104 = vmatprep.subr.bf16.mxu0 %v3770_v18  ;;  %3136 = vmatprep.subr.bf16.mxu1 %v3875_v38 }
 0x6b6   :  { %3106 = vmatpush1.bf16.msra.mxu0 %v3778_v22  ;;  %3138 = vmatpush1.bf16.msra.mxu1 %v3879_v45  ;;  %v4246_v45 = vpop.permute.xlu1 %2350 }
 0x6b7   :  { %3108 = vmatprep.subr.bf16.mxu0 %v3783_v25  ;;  %3140 = vmatprep.subr.bf16.mxu1 %v3883_v46  ;;  %v4251_v46 = vld [vmem:[%s4388_s3] sm:$0xff]  ;;  %vm2352_vm0 = vcmp.eq.s32.totalorder %v4246_v45, 1 }
 0x6ba   :  { %3110 = vmatpush1.bf16.msra.mxu0 %v3791_v29  ;;  %3142 = vmatpush1.bf16.msra.mxu1 %v3887_v53  ;;  %v847_v53 = vpop.xlane.xlu0 %846 }
 0x6bb   :  { %3112 = vmatprep.subr.bf16.mxu0 %v3796_v33  ;;  %3144 = vmatprep.subr.bf16.mxu1 %v3891_v54  ;;  %v1062_v54 = vpop.xlane.xlu1 %1061  ;;  %v4254_v13 = vadd.f32 %v847_v53, %v4251_v46 }
 0x6bc   :  { %v1063_v50 = vadd.f32 %v1062_v54, %v4251_v46 }
 0x6bd   :  { %v849_v52 = vsub.f32 -inf, %v4254_v13 }
 0x6be   :  { %3114 = vmatpush1.bf16.msra.mxu0 %v3809_v36  ;;  %3146 = vmatpush1.bf16.msra.mxu1 %v3894_v58  ;;  %v4262_v61 = vmax.f32 %v4254_v13, %v1063_v50  ;;  %v1278_v6 = vpop.xlane.xlu0 %1277 }
 0x6bf   :  { %v850_v8 = vmul.f32 1.442695, %v849_v52  ;;  %v1279_v34 = vadd.f32 %v1278_v6, %v4251_v46  ;;  %v1710_v28 = vpop.xlane.xlu1 %1709 }
 0x6c0   :  { %v1065_v30 = vsub.f32 %v4254_v13, %v4262_v61  ;;  %v1068_v16 = vsub.f32 %v1063_v50, %v4262_v61  ;;  %v1711_v44 = vadd.f32 %v1710_v28, %v4251_v46 }
 0x6c2   :  { %v1494_v62 = vpop.xlane.xlu0 %1493  ;;  %v1066_v21 = vmul.f32 1.442695, %v1065_v30 }
 0x6c3   :  { %v1495_v60 = vadd.f32 %v1494_v62, %v4251_v46 }
 0x774   :  { %v2027_v39 = vpop.f32.mrb[12].mxu0  ;;  %v2098_v43 = vpop.f32.mrb[12].mxu1 }
 0x775   :  { %v3183_v47 = vadd.f32 %v2027_v39, %v3922_v24  ;;  %v2029_v51 = vpop.f32.mrb[13].mxu0  ;;  %v2100_v59 = vpop.f32.mrb[13].mxu1  ;;  %v3199_v22 = vadd.f32 %v2098_v43, %v3926_v55 }
 0x776   :  { %v3184_v63 = vadd.f32 %v2029_v51, %v3920_v23  ;;  %v3200_v15 = vadd.f32 %v2100_v59, %v3928_v57  ;;  %v1926_v39 = vpop.xlane.xlu0 %1925 }
 0x777   :  { %v2544_v5 = vmul.f32 -1.442695, %v3183_v47  ;;  %v1927_v59 = vadd.f32 %v1926_v39, %v4251_v46 }
 0x778   :  { %v2545_v10 = vmul.f32 -1.442695, %v3184_v63  ;;  %v2546_v18 = vmul.f32 -1.442695, %v3200_v15 }
 0x779   :  { %3346 = vpow2.f32 %v2544_v5 }
 0x77a   :  { %3348 = vpow2.f32 %v2545_v10 }
 0x77b   :  { %3350 = vpow2.f32 %v2546_v18 }
 0x77c   :  { %3352 = vtanh.f32 %v3199_v22 }
 0x783   :  { %v3347_v25 = vpop.eup %3346 }
 0x784   :  { %v3349_v29 = vpop.eup %3348  ;;  %v2110_v33 = vadd.f32 1.0, %v3347_v25 }
 0x785   :  { %v2116_v36 = vadd.f32 1.0, %v3349_v29  ;;  %v3351_v2 = vpop.eup %3350 }
 0x786   :  { %3354 = vrcp.f32 %v2110_v33  ;;  %v3353_v3 = vpop.eup %3352  ;;  %v2123_v19 = vadd.f32 1.0, %v3351_v2 }
 0x787   :  { %3356 = vrcp.f32 %v2116_v36 }
 0x788   :  { %3358 = vrcp.f32 %v2123_v19 }
 0x790   :  { %v3355_v9 = vpop.eup %3354 }
 0x791   :  { %v3357_v11 = vpop.eup %3356  ;;  %v2127_v17 = vmul.f32 %v3355_v9, %v3353_v3 }
 0x792   :  { %v2126_v27 = vmul.f32 %v3357_v11, %v4195_v48  ;;  %v3359_v58 = vpop.eup %3358 }
 0x794   :  { %v2128_v37 = vadd.f32 %v2127_v17, %v2126_v27 }
 0x796   :  { %3360 = vtanh.f32 %v2128_v37  ;;  %v4244_v38 = vsel %vm2136_vm15, %v2128_v37, %v4195_v48  ;;  %v4271_v48 = vmax.f32 %v4262_v61, %v1279_v34 }
 0x797   :  { %3362 = vpow2.f32 %v850_v8 }
 0x798   :  { %3364 = vpow2.f32 %v1066_v21  ;;  %v1284_v32 = vsub.f32 %v1279_v34, %v4271_v48 }
 0x79a   :  { %v1285_v43 = vmul.f32 1.442695, %v1284_v32 }
 0x7a0   :  { %v3361_v1 = vpop.eup %3360 }
 0x7a1   :  { %v2130_v31 = vmul.f32 %v3361_v1, %v3359_v58  ;;  %v4284_v63 = vpop.eup %3362 }
 0x7a2   :  { %v4291_v18 = vpop.eup %3364 }
 0x7a3   :  { %v2138_v12 = vsel %vm2136_vm15, %v2130_v31, %v4198_v35  ;;  %v4258_v56 = vsel %vm2136_vm15, %v2130_v31, 0.0  ;;  %v4276_v35 = vmax.f32 %v4271_v48, %v1495_v60 }
 0x7a4   :  { %2242 = vmatmul.mubr.f32.vlgmr.msra.gmra.mrb[14].mxu0 %v2138_v12  ;;  %2313 = vmatmul.mubr.f32.vlgmr.msra.gmra.mrb[14].mxu1 %v2138_v12  ;;  %v2140_v4 = vmul.f32 %v3937_v41, %v4258_v56  ;;  %v1069_v41 = vmul.f32 1.442695, %v1068_v16 }
 0x7a5   :  { %v1500_v47 = vsub.f32 %v1495_v60, %v4276_v35  ;;  %v4281_v51 = vmax.f32 %v4276_v35, %v1711_v44  ;;  %v1497_v45 = vsub.f32 %v4271_v48, %v4276_v35  ;;  %2600 = vmatprep.mubr.msk.f32.mxu0 %vm3542_vm1, %v3539_v0 }
 0x7a6   :  { %2141 = vadd.xlane.f32.xlu1 %v2140_v4  ;;  %3366 = vpow2.f32 %v1069_v41 }
 0x7a7   :  { %3368 = vpow2.f32 %v1285_v43  ;;  %v1501_v5 = vmul.f32 1.442695, %v1500_v47  ;;  %v1716_v10 = vsub.f32 %v1711_v44, %v4281_v51  ;;  %v4289_v15 = vmax.f32 %v4281_v51, %v1927_v59  ;;  %v3412_v47 = vld [vmem:[%s4393_s8] ss:$0 sm:$0xff] }
 0x7a9   :  { %3370 = vpow2.f32 %v1501_v5  ;;  %v1717_v22 = vmul.f32 1.442695, %v1716_v10  ;;  %v1932_v25 = vsub.f32 %v1927_v59, %v4289_v15  ;;  %v1281_v10 = vsub.f32 %v4262_v61, %v4271_v48 }
 0x7ab   :  { %3372 = vpow2.f32 %v1717_v22  ;;  %v1933_v33 = vmul.f32 1.442695, %v1932_v25  ;;  %v1282_v22 = vmul.f32 1.442695, %v1281_v10  ;;  %v1498_v25 = vmul.f32 1.442695, %v1497_v45 }
 0x7ac   :  { %v2395_v45 = vld [vmem:[#allocation9 + $0x40] sm:$0xff] }
 0x7ad   :  { %3374 = vpow2.f32 %v1933_v33  ;;  %v1713_v33 = vsub.f32 %v4276_v35, %v4281_v51 }
 0x7b0   :  { %v4295_v29 = vpop.eup %3366 }
 0x7b1   :  { %v4298_v36 = vpop.eup %3368 }
 0x7b3   :  { %v4301_v2 = vpop.eup %3370 }
 0x7b5   :  { %v4304_v3 = vpop.eup %3372 }
 0x7b7   :  { %859 = vperm.xlu1 %3249, %v4284_v63   ;;  %v4307_v9 = vpop.eup %3374 }
 0x7bb   :  { %1075 = vperm.xlu1 %3249, %v4291_v18  }
 0x7bf   :  { %1081 = vperm.xlu1 %3249, %v4295_v29  }
 0x7c3   :  { %1297 = vperm.xlu1 %3249, %v4298_v36  }
 0x7c7   :  { %1513 = vperm.xlu1 %3249, %v4301_v2  }
 0x7cb   :  { %1729 = vperm.xlu1 %3249, %v4304_v3  }
 0x7cf   :  { %1945 = vperm.xlu1 %3249, %v4307_v9  }
 0x833   :  { %v2142_v11 = vpop.xlane.xlu1 %2141 }
 0x834   :  { %v2143_v17 = vadd.f32 %v2142_v11, %v4251_v46  ;;  %v1714_v11 = vmul.f32 1.442695, %v1713_v33  ;;  %v2397_v33 = vld [vmem:[#allocation9 + $0x50] sm:$0xff] }
 0x836   :  { %v4312_v19 = vmax.f32 %v4289_v15, %v2143_v17 }
 0x838   :  { %v2148_v26 = vsub.f32 %v2143_v17, %v4312_v19  ;;  %v1929_v17 = vsub.f32 %v4281_v51, %v4289_v15  ;;  %v2145_v61 = vsub.f32 %v4289_v15, %v4312_v19  ;;  %v2387_v51 = vld [vmem:[#allocation9] sm:$0xff] }
 0x83a   :  { %v2149_v27 = vmul.f32 1.442695, %v2148_v26  ;;  %v1930_v26 = vmul.f32 1.442695, %v1929_v17  ;;  %v2146_v48 = vmul.f32 1.442695, %v2145_v61 }
 0x83b   :  { %v2402_v61 = vld [vmem:[#allocation9 + $0x78] sm:$0xff] }
 0x83c   :  { %3376 = vpow2.f32 %v2149_v27 }
 0x846   :  { %v4315_v37 = vpop.eup %3376 }
 0x847   :  { %2161 = vperm.xlu1 %3249, %v4315_v37  }
 0x877   :  { %v2243_v53 = vpop.f32.mrb[14].mxu0  ;;  %v2314_v54 = vpop.f32.mrb[14].mxu1 }
 0x878   :  { %v3185_v58 = vadd.f32 %v2243_v53, %v3922_v24  ;;  %v2245_v1 = vpop.f32.mrb[15].mxu0  ;;  %v2316_v50 = vpop.f32.mrb[15].mxu1  ;;  %v3201_v8 = vadd.f32 %v2314_v54, %v3926_v55 }
 0x879   :  { %v3186_v31 = vadd.f32 %v2245_v1, %v3920_v23  ;;  %v3202_v4 = vadd.f32 %v2316_v50, %v3928_v57  ;;  %v2388_v1 = vld [vmem:[#allocation9 + $0x8] sm:$0xff]  ;;  %v2389_v50 = vld [vmem:[#allocation9 + $0x10] sm:$0xff] }
 0x87a   :  { %v2547_v12 = vmul.f32 -1.442695, %v3185_v58  ;;  %v3148_v15 = vpack.c.bf16 %v2388_v1, %v2387_v51 }
 0x87b   :  { %v2548_v52 = vmul.f32 -1.442695, %v3186_v31  ;;  %v2549_v6 = vmul.f32 -1.442695, %v3202_v4  ;;  %v3541_v31 = vmov 0.0|0.0   ;;  %v2391_v4 = vld [vmem:[#allocation9 + $0x20] sm:$0xff] }
 0x87c   :  { %3378 = vpow2.f32 %v2547_v12  ;;  %3147 = vmatprep.subr.bf16.mxu0 %v3541_v31  ;;  %v2390_v12 = vld [vmem:[#allocation9 + $0x18] sm:$0xff] }
 0x87d   :  { %3380 = vpow2.f32 %v2548_v52  ;;  %3149 = vmatpush3.bf16.msra.mxu0 %v3148_v15  ;;  %v3151_v52 = vpack.c.bf16 %v2390_v12, %v2389_v50 }
 0x87e   :  { %3382 = vpow2.f32 %v2549_v6  ;;  %3150 = vmatprep.subr.bf16.mxu0 %v3541_v31  ;;  %v2392_v6 = vld [vmem:[#allocation9 + $0x28] sm:$0xff] }
 0x87f   :  { %3384 = vtanh.f32 %v3201_v8  ;;  %v3154_v8 = vpack.c.bf16 %v2392_v6, %v2391_v4 }
 0x881   :  { %3152 = vmatpush3.bf16.msra.mxu0 %v3151_v52 }
 0x882   :  { %3153 = vmatprep.subr.bf16.mxu0 %v3541_v31 }
 0x885   :  { %3155 = vmatpush3.bf16.msra.mxu0 %v3154_v8 }
 0x886   :  { %v3379_v30 = vpop.eup %3378  ;;  %3156 = vmatprep.subr.bf16.mxu0 %v3541_v31 }
 0x887   :  { %v3381_v34 = vpop.eup %3380  ;;  %v2326_v62 = vadd.f32 1.0, %v3379_v30  ;;  %v2393_v30 = vld [vmem:[#allocation9 + $0x30] sm:$0xff] }
 0x888   :  { %v2332_v16 = vadd.f32 1.0, %v3381_v34  ;;  %v3383_v24 = vpop.eup %3382  ;;  %v2394_v34 = vld [vmem:[#allocation9 + $0x38] sm:$0xff] }
 0x889   :  { %3386 = vrcp.f32 %v2326_v62  ;;  %v3385_v21 = vpop.eup %3384  ;;  %v2339_v41 = vadd.f32 1.0, %v3383_v24  ;;  %v3157_v62 = vpack.c.bf16 %v2394_v34, %v2393_v30 }
 0x88a   :  { %3388 = vrcp.f32 %v2332_v16  ;;  %v855_v16 = vmul.f32 0.0, %v4284_v63 }
 0x88b   :  { %3390 = vrcp.f32 %v2339_v41  ;;  %3158 = vmatpush3.bf16.msra.mxu0 %v3157_v62 }
 0x88c   :  { %3159 = vmatprep.subr.bf16.mxu0 %v3541_v31 }
 0x893   :  { %v3387_v23 = vpop.eup %3386 }
 0x894   :  { %v3389_v60 = vpop.eup %3388  ;;  %v2343_v28 = vmul.f32 %v3387_v23, %v3385_v21 }
 0x895   :  { %v2342_v32 = vmul.f32 %v3389_v60, %v4244_v38  ;;  %v3391_v55 = vpop.eup %3390  ;;  %v852_v38 = vsub.f32 %v4254_v13, %v4254_v13 }
 0x897   :  { %v2344_v57 = vadd.f32 %v2343_v28, %v2342_v32  ;;  %v853_v5 = vmul.f32 1.442695, %v852_v38 }
 0x899   :  { %3392 = vtanh.f32 %v2344_v57 }
 0x89a   :  { %3394 = vpow2.f32 %v853_v5 }
 0x89b   :  { %3396 = vpow2.f32 %v1282_v22 }
 0x89c   :  { %3398 = vpow2.f32 %v1498_v25  ;;  %v2396_v25 = vld [vmem:[#allocation9 + $0x48] sm:$0xff] }
 0x89d   :  { %3400 = vpow2.f32 %v1714_v11 }
 0x89e   :  { %3402 = vpow2.f32 %v1930_v26  ;;  %v2401_v26 = vld [vmem:[#allocation9 + $0x70] sm:$0xff] }
 0x89f   :  { %3404 = vpow2.f32 %v2146_v48 }
 0x8a3   :  { %v3393_v44 = vpop.eup %3392 }
 0x8a4   :  { %v2346_v39 = vmul.f32 %v3393_v44, %v3391_v55  ;;  %v3395_v13 = vpop.eup %3394 }
 0x8a5   :  { %v3397_v27 = vpop.eup %3396  ;;  %v856_v24 = vadd.f32 %v3395_v13, %v855_v16 }
 0x8a6   :  { %v4324_v43 = vsel %vm2352_vm0, %v2346_v39, 0.0  ;;  %v3399_v53 = vpop.eup %3398 }
 0x8a7   :  { %v2354_v59 = vmul.f32 %v3412_v47, %v4324_v43  ;;  %v3401_v35 = vpop.eup %3400  ;;  %v1071_v21 = vmul.f32 %v4291_v18, %v856_v24 }
 0x8a8   :  { %v3403_v54 = vpop.eup %3402 }
 0x8a9   :  { %2355 = vadd.xlane.f32.xlu0 %v2354_v59  ;;  %v3405_v58 = vpop.eup %3404  ;;  %v1072_v23 = vadd.f32 %v4295_v29, %v1071_v21 }
 0x8ab   :  { %v1287_v60 = vmul.f32 %v3397_v27, %v1072_v23 }
 0x8ad   :  { %v1288_v28 = vadd.f32 %v4298_v36, %v1287_v60 }
 0x8af   :  { %v1503_v41 = vmul.f32 %v3399_v53, %v1288_v28 }
 0x8b1   :  { %v1504_v32 = vadd.f32 %v4301_v2, %v1503_v41 }
 0x8b3   :  { %v1719_v44 = vmul.f32 %v3401_v35, %v1504_v32 }
 0x8b5   :  { %v1720_v59 = vadd.f32 %v4304_v3, %v1719_v44  ;;  %v2398_v3 = vld [vmem:[#allocation9 + $0x58] sm:$0xff] }
 0x8b6   :  { %v3163_v17 = vpack.c.bf16 %v2398_v3, %v2397_v33 }
 0x8b7   :  { %v1935_v29 = vmul.f32 %v3403_v54, %v1720_v59 }
 0x8b9   :  { %v1936_v36 = vadd.f32 %v4307_v9, %v1935_v29  ;;  %v2399_v9 = vld [vmem:[#allocation9 + $0x60] sm:$0xff] }
 0x8bb   :  { %v2151_v5 = vmul.f32 %v3405_v58, %v1936_v36 }
 0x8bd   :  { %v2152_v2 = vadd.f32 %v4315_v37, %v2151_v5 }
 0x8bf   :  { %865 = vperm.xlu0 %3248, %v3395_v13   ;;  %v2400_v13 = vld [vmem:[#allocation9 + $0x68] sm:$0xff] }
 0x8c0   :  { %v3166_v37 = vpack.c.bf16 %v2400_v13, %v2399_v9 }
 0x8c3   :  { %1291 = vperm.xlu0 %3248, %v3397_v27   ;;  %v3169_v27 = vpack.c.bf16 %v2402_v61, %v2401_v26 }
 0x8c7   :  { %1507 = vperm.xlu0 %3248, %v3399_v53   ;;  %v860_v53 = vpop.permute.xlu1 %859 }
 0x8c8   :  { %v862_v51 = vmul.f32 0.0, %v860_v53 }
 0x8cb   :  { %1723 = vperm.xlu0 %3248, %v3401_v35  }
 0x8cf   :  { %1939 = vperm.xlu0 %3248, %v3403_v54  }
 0x8d3   :  { %2155 = vperm.xlu0 %3248, %v3405_v58   ;;  %v1076_v58 = vpop.permute.xlu1 %1075 }
 0x8d7   :  { %v1082_v50 = vpop.permute.xlu1 %1081 }
 0x8d8   :  { %v1084_v12 = vmul.f32 %v1082_v50, %v3996_v7 }
 0x8db   :  { %v1298_v4 = vpop.permute.xlu1 %1297 }
 0x8dc   :  { %v1300_v8 = vmul.f32 %v1298_v4, %v4047_v20 }
 0x8df   :  { %v1514_v34 = vpop.permute.xlu1 %1513 }
 0x8e0   :  { %v1516_v16 = vmul.f32 %v1514_v34, %v4098_v49 }
 0x8e3   :  { %v1730_v24 = vpop.permute.xlu1 %1729 }
 0x8e4   :  { %v1732_v60 = vmul.f32 %v1730_v24, %v4149_v14 }
 0x8e7   :  { %v1946_v7 = vpop.permute.xlu1 %1945 }
 0x8eb   :  { %v2162_v20 = vpop.permute.xlu1 %2161 }
 0x936   :  { %v2356_v57 = vpop.xlane.xlu0 %2355 }
 0x937   :  { %v2357_v55 = vadd.f32 %v2356_v57, %v4251_v46  ;;  %v1948_v57 = vmul.f32 %v1946_v7, %v4200_v40  ;;  %v2550_v40 = vld [vmem:[%s4395_s10] ss:$0 sm:$0xff] }
 0x939   :  { %v2358_v39 = vmax.f32 %v4312_v19, %v2357_v55 }
 0x93b   :  { %v2359_v47 = vsub.f32 %v4312_v19, %v2358_v39  ;;  %v2362_v63 = vsub.f32 %v2357_v55, %v2358_v39  ;;  %v3160_v19 = vpack.c.bf16 %v2396_v25, %v2395_v45 }
 0x93d   :  { %v2360_v18 = vmul.f32 1.442695, %v2359_v47  ;;  %v2363_v38 = vmul.f32 1.442695, %v2362_v63  ;;  %3161 = vmatpush3.bf16.msra.mxu0 %v3160_v19  ;;  %v2164_v47 = vmul.f32 %v2162_v20, %v4258_v56 }
 0x93e   :  { %3162 = vmatprep.subr.bf16.mxu0 %v3541_v31  ;;  %v866_v35 = vpop.permute.xlu0 %865 }
 0x93f   :  { %3406 = vpow2.f32 %v2360_v18  ;;  %v868_v54 = vmul.f32 %v866_v35, %v3939_v42 }
 0x940   :  { %3408 = vpow2.f32 %v2363_v38 }
 0x941   :  { %3164 = vmatpush3.bf16.msra.mxu0 %v3163_v17  ;;  %v869_v1 = vadd.f32 %v868_v54, %v862_v51 }
 0x942   :  { %3165 = vmatprep.subr.bf16.mxu0 %v3541_v31 }
 0x943   :  { %v1078_v15 = vmul.f32 %v1076_v58, %v869_v1 }
 0x945   :  { %3167 = vmatpush3.bf16.msra.mxu0 %v3166_v37  ;;  %v1085_v52 = vadd.f32 %v1084_v12, %v1078_v15 }
 0x946   :  { %3168 = vmatprep.subr.bf16.mxu0 %v3541_v31  ;;  %v1292_v31 = vpop.permute.xlu0 %1291 }
 0x947   :  { %v1294_v6 = vmul.f32 %v1292_v31, %v1085_v52 }
 0x949   :  { %v3407_v10 = vpop.eup %3406  ;;  %3170 = vmatpush3.bf16.msra.mxu0 %v3169_v27  ;;  %v1301_v30 = vadd.f32 %v1300_v8, %v1294_v6 }
 0x94a   :  { %v3409_v46 = vpop.eup %3408  ;;  %v2365_v22 = vmul.f32 %v3407_v10, %v2152_v2  ;;  %2369 = vperm.xlu0 %3248, %v3407_v10   ;;  %v1508_v0 = vpop.permute.xlu0 %1507 }
 0x94b   :  { %2375 = vperm.xlu1 %3249, %v3409_v46   ;;  %v1510_v62 = vmul.f32 %v1508_v0, %v1301_v30 }
 0x94c   :  { %v2366_v11 = vadd.f32 %v3409_v46, %v2365_v22 }
 0x94d   :  { %v1517_v42 = vadd.f32 %v1516_v16, %v1510_v62 }
 0x94e   :  { %3410 = vrcp.f32 %v2366_v11  ;;  %v1724_v21 = vpop.permute.xlu0 %1723 }
 0x94f   :  { %v1726_v23 = vmul.f32 %v1724_v21, %v1517_v42 }
 0x951   :  { %v1733_v28 = vadd.f32 %v1732_v60, %v1726_v23 }
 0x952   :  { %v1940_v41 = vpop.permute.xlu0 %1939 }
 0x953   :  { %v1942_v32 = vmul.f32 %v1940_v41, %v1733_v28 }
 0x955   :  { %v1949_v55 = vadd.f32 %v1948_v57, %v1942_v32 }
 0x956   :  { %v2156_v44 = vpop.permute.xlu0 %2155 }
 0x957   :  { %v2158_v39 = vmul.f32 %v2156_v44, %v1949_v55 }
 0x958   :  { %v3411_v48 = vpop.eup %3410 }
 0x959   :  { %2383 = vperm.xlu0 %3248, %v3411_v48   ;;  %v2165_v59 = vadd.f32 %v2164_v47, %v2158_v39 }
 0x9c9   :  { %v2370_v49 = vpop.permute.xlu0 %2369 }
 0x9ca   :  { %v2376_v63 = vpop.permute.xlu1 %2375  ;;  %v2372_v38 = vmul.f32 %v2370_v49, %v2165_v59 }
 0x9cb   :  { %v2378_v18 = vmul.f32 %v2376_v63, %v4324_v43 }
 0x9cd   :  { %v2379_v29 = vadd.f32 %v2378_v18, %v2372_v38 }
 0x9d8   :  { %v2384_v14 = vpop.permute.xlu0 %2383 }
 0x9d9   :  { %v2386_v36 = vmul.f32 %v2384_v14, %v2379_v29 }
 0x9db   :  { %2601 = vmatmul.mubr.f32.vlgmr.msra.gmra.mrb[16].mxu0 %v2386_v36 }
 0xaae   :  { %v2476_v5 = vpop.f32.mrb[16].mxu0 }
 0xaaf   :  { %v2477_v2 = vadd.f32 %v2550_v40, %v2476_v5  ;;  %v2602_v10 = vpop.f32.mrb[17].mxu0 }
 0xab1   :  { %2480 = vst [vmem:[#allocation11] sm:$0xff] %v2477_v2 }
 0xab2   :  { %3512 = shalt.err (!%p3509_p8)
}
 0xab3   :  { %s3513_s22 = scalar_lea.hbm %s4396_s11, 128 }
 0xab4   :  { %p3514_p9 = scmp.ne.s32.totalorder %s4396_s11, %s3513_s22  ;;  %p3517_p10 = scmp.lt.u32.totalorder %s3513_s22, %s4396_s11 }
 0xab6   :  { %p3519_p11 = pnand %p3517_p10, %p3514_p9 }
 0xab8   :  { %3522 = shalt.err (!%p3519_p11)
}
 0xab9   :  { %2490 = dma.vmem_to_hbm [thread:$0]  %s2488_s19, 128, %s4396_s11, [#allocation5]  }
 0xaba   :  { %3529 = dma.done.wait [#allocation5], 128  }
 0xabb   :  { %3530 = vsyncadd [#allocation5], 4294967168 }
 0xabc   :  { %2494 = vsyncpa [#allocation4], 1 }
 0xabd   :  { %2495 = vsyncpa [#allocation7], 1 }
 0xabe   :  { %2496 = vsyncpa [#allocation10], 1 }
 0xabf   :  { %2497 = vsyncpa [#allocation5], 1 }

</bundles_post_ra>
